<compile_context>
chip_gen: v5e
topology: v5e:2x2
jax: 0.10.0
libtpu: 0.0.40
codegen_flags: <defaults>
</compile_context>

<pallas_src>
import math

import jax
import jax.numpy as jnp
from jax import lax
from jax.experimental import pallas as pl
from jax.experimental.pallas import tpu as pltpu


# ---------------------------------------------------------------------------
# Fused SCPM kernel: one grid step == B images, everything stays in VMEM.
# Static config (B, H, WC, per-conv row-offset lists, matmul dtype) is closed
# over; the weights arrive as full-array VMEM-resident refs (single-buffered).
# ---------------------------------------------------------------------------
def _make_scpm_kernel(B, H, WC, off_d1, off_aspp, mm_dtype):
    BH = B * H
    n_a = len(off_aspp)

    def kernel(x_ref, rhs2, rhsc, bcbr, rhs3, b3, rhsa, ba, rhs4, out_ref):
        x = x_ref[...]                                            # (BH, WC) f32

        # Row-within-image index + per-offset validity masks, hoisted once.
        hh = lax.broadcasted_iota(jnp.int32, (BH, WC), 0) % H
        masks = {}
        for off in sorted({o for o in off_d1 + off_aspp if o != 0}):
            masks[off] = (hh < H - off) if off > 0 else (hh >= -off)

        def shift(y, off):
            # out[r] = y[r + off] if the source row lies inside the same image,
            # else 0.  XLU roll + VPU mask — keeps the MXU free.
            if off == 0:
                return y
            rolled = pltpu.roll(y, shift=(-off) % BH, axis=0)
            return jnp.where(masks[off], rolled, 0.0)

        def fused_conv(x_in, rhs_ref, offsets):
            # One wide-RHS MXU matmul for every surviving kernel tap, then
            # per-tap row shift + f32 accumulate.
            y = jnp.dot(x_in.astype(mm_dtype), rhs_ref[...],
                        preferred_element_type=jnp.float32)
            acc = shift(y[:, :WC], offsets[0])
            for i in range(1, len(offsets)):
                acc = acc + shift(y[:, i * WC:(i + 1) * WC], offsets[i])
            return acc

        # ---- stem: conv2 -> CBR -> conv3+bn -> +res1 -> relu ----
        t1 = fused_conv(x, rhs2, off_d1)                                  # res1
        t2 = jnp.maximum(fused_conv(t1, rhsc, off_d1) + bcbr[...], 0.0)   # CBR
        t3 = jnp.maximum(fused_conv(t2, rhs3, off_d1) + b3[...] + t1, 0.0)

        # ---- ASPP (1x1 + d6 + d12 + d18 + pooled) via one wide matmul ----
        ya = jnp.dot(t3.astype(mm_dtype), rhsa[...],
                     preferred_element_type=jnp.float32)
        aspp = shift(ya[:, :WC], off_aspp[0])
        for i in range(1, n_a):
            aspp = aspp + shift(ya[:, i * WC:(i + 1) * WC], off_aspp[i])
        # pooled branch: per-image row mean of the last block (the W-mean is
        # folded into the weights; the H-mean commutes with the right-mult).
        yg = ya[:, n_a * WC:(n_a + 1) * WC]
        if B == 1:
            aspp = aspp + jnp.mean(yg, axis=0, keepdims=True)
        else:
            pooled = jnp.mean(yg.reshape(B, H, WC), axis=1, keepdims=True)
            aspp = aspp + jnp.broadcast_to(pooled, (B, H, WC)).reshape(BH, WC)
        aspp = aspp + ba[...]

        # ---- conv4 over lane-concat([aspp, res2]): single K=2*WC matmul ----
        cat = jnp.concatenate([aspp, t3], axis=-1)                 # (BH, 2*WC)
        y4 = jnp.dot(cat.astype(mm_dtype), rhs4[...],
                     preferred_element_type=jnp.float32)
        out = shift(y4[:, :WC], off_d1[0])
        for i in range(1, len(off_d1)):
            out = out + shift(y4[:, i * WC:(i + 1) * WC], off_d1[i])

        out_ref[...] = out.astype(out_ref.dtype)

    return kernel


# ---------------------------------------------------------------------------
# Host-side weight preparation (call ONCE, outside the per-step path).
# Builds the fused wide-RHS lane-mixing matrices the kernel consumes.
# ---------------------------------------------------------------------------
def prepare_scpm_weights(params, H, W, C, mm_dtype=jnp.bfloat16):
    f32 = jnp.float32
    WC = W * C

    def tap_mats(w, d):
        # (3,3,Cin,Cout) HWIO -> 3 lane-mix matrices (W*Cin, W*Cout), the kx
        # width shifts folded in:
        #   (x_row @ M[ky])[w*Co+co] = sum_{kx,ci} x_row[(w+(kx-1)*d)*Ci+ci]*w[ky,kx,ci,co]
        kh, kw, Cin, Cout = w.shape
        mats = []
        for ky in range(kh):
            m = jnp.zeros((W * Cin, W * Cout), f32)
            for kx in range(kw):
                sh = jnp.eye(W, k=-(kx - 1) * d, dtype=f32)   # zero if |k| >= W
                m = m + jnp.kron(sh, w[ky, kx].astype(f32))
            mats.append(m)
        return mats

    def pruned_taps(w, d, out_scale=None):
        # -> (row_offsets, per-offset matrices); taps whose row shift is
        #    statically dead (|off| >= H) are pruned.
        if out_scale is not None:
            w = w * out_scale.reshape(1, 1, 1, -1)
        mats = tap_mats(w, d)
        offs, blocks = [], []
        for ky in range(w.shape[0]):
            off = (ky - 1) * d
            if abs(off) >= H:
                continue
            offs.append(off)
            blocks.append(mats[ky])
        return offs, blocks

    def chan_row(v):                      # per-channel -> (1, W*C) lane row
        return jnp.tile(v.reshape(1, C).astype(f32), (1, W))

    sc_cbr, sh_cbr = params["bn_cbr"]
    sc_scpm, sh_scpm = params["bn_scpm"]

    # ---- d=1 stem convs (BatchNorm eval-mode folded into weight + bias row)
    off_d1, blk2 = pruned_taps(params["w_conv2"], 1)
    off_c, blkc = pruned_taps(params["w_cbr"], 1, sc_cbr)
    off_3, blk3 = pruned_taps(params["w_conv3"], 1, sc_scpm)
    assert tuple(off_c) == tuple(off_d1) == tuple(off_3)

    # ---- ASPP: project every branch by its slice of the 1x1 output conv,
    #      then merge all taps that land on the same row offset.
    proj = params["w_aspp_out"][0, 0].astype(f32)                 # (5C, C)
    p_img, p_1, p_6, p_12, p_18 = (proj[i * C:(i + 1) * C] for i in range(5))

    merged = {}
    for w, d, p_d in ((params["w_aspp_6"], 6, p_6),
                      (params["w_aspp_12"], 12, p_12),
                      (params["w_aspp_18"], 18, p_18)):
        w_proj = jnp.einsum("ykab,bc->ykac", w.astype(f32), p_d)
        offs, blocks = pruned_taps(w_proj, d)
        for off, blk in zip(offs, blocks):
            merged[off] = merged.get(off, 0.0) + blk
    # 1x1 ASPP branch folds into the un-shifted (off=0) tap
    merged[0] = merged.get(0, 0.0) + jnp.kron(
        jnp.eye(W, dtype=f32), params["w_aspp_1"][0, 0].astype(f32) @ p_1)
    off_aspp = sorted(merged)
    # pooled branch: W-mean folded into the weight; H-mean taken in-kernel.
    g = jnp.kron(jnp.ones((W, W), f32) / W,
                 params["w_aspp_mean"][0, 0].astype(f32) @ p_img)
    rhs_aspp = jnp.concatenate([merged[o] for o in off_aspp] + [g], axis=1)

    b_aspp = (params["b_aspp_out"]
              + params["b_aspp_mean"] @ p_img + params["b_aspp_1"] @ p_1
              + params["b_aspp_6"] @ p_6 + params["b_aspp_12"] @ p_12
              + params["b_aspp_18"] @ p_18)

    # ---- conv4 over lane-concat([aspp, res2]): stack the two halves along K
    off_4a, blk4a = pruned_taps(params["w_conv4"][:, :, :C, :], 1)
    off_4b, blk4b = pruned_taps(params["w_conv4"][:, :, C:, :], 1)
    assert tuple(off_4a) == tuple(off_4b) == tuple(off_d1)
    rhs4 = jnp.concatenate(
        [jnp.concatenate([a, b], axis=0) for a, b in zip(blk4a, blk4b)], axis=1)

    cast = lambda m: m.astype(mm_dtype)
    weights = (
        cast(jnp.concatenate(blk2, axis=1)),     # rhs2     (WC, 3*WC)
        cast(jnp.concatenate(blkc, axis=1)),     # rhs_cbr  (WC, 3*WC)
        chan_row(sh_cbr),                        # b_cbr    (1, WC) f32
        cast(jnp.concatenate(blk3, axis=1)),     # rhs3     (WC, 3*WC)
        chan_row(sh_scpm),                       # b3       (1, WC) f32
        cast(rhs_aspp),                          # rhs_aspp (WC, (n_off+1)*WC)
        chan_row(b_aspp),                        # b_aspp   (1, WC) f32
        cast(rhs4),                              # rhs4     (2*WC, 3*WC)
    )
    meta = dict(H=H, W=W, C=C, off_d1=tuple(off_d1),
                off_aspp=tuple(off_aspp), mm_dtype=mm_dtype)
    return weights, meta


# ---------------------------------------------------------------------------
# Public forward: NCHW in / NCHW out, single pallas_call inside.
# ---------------------------------------------------------------------------
def scpm_forward(x_nchw, prepared, block_images=None):
    weights, meta = prepared
    H, W, C = meta["H"], meta["W"], meta["C"]
    WC = W * C
    N = x_nchw.shape[0]
    assert x_nchw.shape == (N, C, H, W), x_nchw.shape

    # Sublane batching: fill the MXU's M dimension, but keep >= 2 grid steps
    # so dimension_semantics=("parallel",) still shards over v7x's 2 cores.
    if block_images is None:
        cands = [b for b in range(1, N + 1) if N % b == 0 and b * H <= 128] or [1]
        pref = [b for b in cands if N // b >= 2] or cands
        block_images = max(pref)
    B = block_images
    assert N % B == 0, (N, B)
    BH = B * H

    x = jnp.transpose(x_nchw, (0, 2, 3, 1)).astype(jnp.float32).reshape(N * H, WC)

    kernel = _make_scpm_kernel(B, H, WC, meta["off_d1"], meta["off_aspp"],
                               meta["mm_dtype"])

    def data_spec():
        return pl.BlockSpec((BH, WC), lambda n: (n, 0))

    # Full-array VMEM-resident constants: single-buffered across the grid.
    const_spec = pl.BlockSpec(memory_space=pltpu.MemorySpace.VMEM)

    out = pl.pallas_call(
        kernel,
        out_shape=jax.ShapeDtypeStruct((N * H, WC), jnp.float32),
        grid=(N // B,),
        in_specs=[data_spec()] + [const_spec] * len(weights),
        out_specs=data_spec(),
        compiler_params=pltpu.CompilerParams(
            dimension_semantics=("parallel",),
            vmem_limit_bytes=32 * 1024 * 1024),
    )(x, *weights)

    return jnp.transpose(out.reshape(N, H, W, C), (0, 3, 1, 2))


# ---------------------------------------------------------------------------
# Pure-JAX reference (for correctness checking).
# ---------------------------------------------------------------------------
def _conv_ref(x, w, d=1, bias=None):
    pad = d * (w.shape[0] - 1) // 2
    out = jax.lax.conv_general_dilated(
        x, w, window_strides=(1, 1), padding=((pad, pad), (pad, pad)),
        rhs_dilation=(d, d), dimension_numbers=("NHWC", "HWIO", "NHWC"),
        precision=jax.lax.Precision.HIGHEST)
    return out if bias is None else out + bias


def scpm_reference(x_nchw, p):
    x = jnp.transpose(x_nchw, (0, 2, 3, 1)).astype(jnp.float32)
    t = _conv_ref(x, p["w_conv2"])
    res1 = t
    sc, sh = p["bn_cbr"]
    t = jax.nn.relu(_conv_ref(t, p["w_cbr"]) * sc + sh)
    sc, sh = p["bn_scpm"]
    t = jax.nn.relu(_conv_ref(t, p["w_conv3"]) * sc + sh + res1)
    res2 = t
    N, H, W, C = t.shape
    pooled = jnp.mean(t, axis=(1, 2))
    img = pooled @ p["w_aspp_mean"][0, 0] + p["b_aspp_mean"]
    img = jnp.broadcast_to(img[:, None, None, :], (N, H, W, C))
    a1 = _conv_ref(t, p["w_aspp_1"], bias=p["b_aspp_1"])
    a6 = _conv_ref(t, p["w_aspp_6"], 6, p["b_aspp_6"])
    a12 = _conv_ref(t, p["w_aspp_12"], 12, p["b_aspp_12"])
    a18 = _conv_ref(t, p["w_aspp_18"], 18, p["b_aspp_18"])
    cat5 = jnp.concatenate([img, a1, a6, a12, a18], axis=-1)
    aspp = _conv_ref(cat5, p["w_aspp_out"], bias=p["b_aspp_out"])
    cat2 = jnp.concatenate([aspp, res2], axis=-1)
    out = _conv_ref(cat2, p["w_conv4"])
    return jnp.transpose(out, (0, 3, 1, 2))


# ---------------------------------------------------------------------------
# Deterministic parameter init (xavier_uniform conv weights, default conv bias
# init, BN gamma=1 / beta=0 evaluated with running stats mean=0, var=1).
# ---------------------------------------------------------------------------
def init_params(key, C):
    eps = 1e-5
    bn_scale = jnp.full((C,), 1.0 / math.sqrt(1.0 + eps), jnp.float32)
    bn_shift = jnp.zeros((C,), jnp.float32)

    def xavier(k, kh, kw, cin, cout):
        fan_in, fan_out = cin * kh * kw, cout * kh * kw
        b = math.sqrt(6.0 / (fan_in + fan_out))
        return jax.random.uniform(k, (kh, kw, cin, cout), jnp.float32, -b, b)

    def cbias(k, kh, kw, cin, cout):
        b = 1.0 / math.sqrt(cin * kh * kw)
        return jax.random.uniform(k, (cout,), jnp.float32, -b, b)

    ks = jax.random.split(key, 16)
    return {
        "w_conv2": xavier(ks[0], 3, 3, C, C),
        "w_cbr": xavier(ks[1], 3, 3, C, C),
        "bn_cbr": (bn_scale, bn_shift),
        "w_conv3": xavier(ks[2], 3, 3, C, C),
        "bn_scpm": (bn_scale, bn_shift),
        "w_aspp_mean": xavier(ks[3], 1, 1, C, C),
        "b_aspp_mean": cbias(ks[4], 1, 1, C, C),
        "w_aspp_1": xavier(ks[5], 1, 1, C, C),
        "b_aspp_1": cbias(ks[6], 1, 1, C, C),
        "w_aspp_6": xavier(ks[7], 3, 3, C, C),
        "b_aspp_6": cbias(ks[8], 3, 3, C, C),
        "w_aspp_12": xavier(ks[9], 3, 3, C, C),
        "b_aspp_12": cbias(ks[10], 3, 3, C, C),
        "w_aspp_18": xavier(ks[11], 3, 3, C, C),
        "b_aspp_18": cbias(ks[12], 3, 3, C, C),
        "w_aspp_out": xavier(ks[13], 1, 1, 5 * C, C),
        "b_aspp_out": cbias(ks[14], 1, 1, 5 * C, C),
        "w_conv4": xavier(ks[15], 3, 3, 2 * C, C),
    }


if __name__ == "__main__":
    N, C, H, W = 4, 8, 16, 16          # W*C == 128 -> perfectly lane-dense tiles
    key = jax.random.PRNGKey(0)
    k_x, k_p = jax.random.split(key)
    x = jax.random.normal(k_x, (N, C, H, W), jnp.float32)
    params = init_params(k_p, C)

    ref = scpm_reference(x, params)

    # 1) f32 matmul inputs: tight parity with the HIGHEST-precision reference.
    prep_f32 = prepare_scpm_weights(params, H, W, C, mm_dtype=jnp.float32)
    out_f32 = jax.block_until_ready(jax.jit(lambda a: scpm_forward(a, prep_f32))(x))
    assert out_f32.shape == (N, C, H, W), out_f32.shape
    assert bool(jnp.all(jnp.isfinite(out_f32)))
    err_f32 = float(jnp.max(jnp.abs(out_f32 - ref)))
    assert err_f32 < 5e-2, f"f32 kernel deviates from reference: max|err|={err_f32}"

    # 2) bf16 MXU inputs (perf configuration): looser tolerance for the cast.
    prep_bf16 = prepare_scpm_weights(params, H, W, C, mm_dtype=jnp.bfloat16)
    out_bf16 = jax.block_until_ready(jax.jit(lambda a: scpm_forward(a, prep_bf16))(x))
    assert bool(jnp.all(jnp.isfinite(out_bf16)))
    err_bf16 = float(jnp.max(jnp.abs(out_bf16 - ref)))
    assert err_bf16 < 2e-1, f"bf16 kernel deviates from reference: max|err|={err_bf16}"

    print("KERNEL_OK")
</pallas_src>

<mosaic_0001>
module attributes {stable_mosaic.version = 11 : i64} {
  func.func @kernel(%arg0: i32, %arg1: memref<32x128xf32, #tpu.memory_space<vmem>>, %arg2: memref<128x384xf32, #tpu.memory_space<vmem>>, %arg3: memref<128x384xf32, #tpu.memory_space<vmem>>, %arg4: memref<1x128xf32, #tpu.memory_space<vmem>>, %arg5: memref<128x384xf32, #tpu.memory_space<vmem>>, %arg6: memref<1x128xf32, #tpu.memory_space<vmem>>, %arg7: memref<128x768xf32, #tpu.memory_space<vmem>>, %arg8: memref<1x128xf32, #tpu.memory_space<vmem>>, %arg9: memref<256x384xf32, #tpu.memory_space<vmem>>, %arg10: memref<32x128xf32, #tpu.memory_space<vmem>>) attributes {dimension_semantics = [#tpu.dimension_semantics<parallel>], iteration_bounds = array<i64: 2>, scalar_prefetch = 0 : i64, scratch_operands = 0 : i64, tpu.core_type = #tpu.core_type<tc>, window_params = [{transform_indices = @transform_0, window_bounds = array<i64: 32, 128>}, {pipeline_mode = #tpu.pipeline_mode<synchronous>, transform_indices = @transform_1, window_bounds = array<i64: 128, 384>}, {pipeline_mode = #tpu.pipeline_mode<synchronous>, transform_indices = @transform_2, window_bounds = array<i64: 128, 384>}, {pipeline_mode = #tpu.pipeline_mode<synchronous>, transform_indices = @transform_3, window_bounds = array<i64: 1, 128>}, {pipeline_mode = #tpu.pipeline_mode<synchronous>, transform_indices = @transform_4, window_bounds = array<i64: 128, 384>}, {pipeline_mode = #tpu.pipeline_mode<synchronous>, transform_indices = @transform_5, window_bounds = array<i64: 1, 128>}, {pipeline_mode = #tpu.pipeline_mode<synchronous>, transform_indices = @transform_6, window_bounds = array<i64: 128, 768>}, {pipeline_mode = #tpu.pipeline_mode<synchronous>, transform_indices = @transform_7, window_bounds = array<i64: 1, 128>}, {pipeline_mode = #tpu.pipeline_mode<synchronous>, transform_indices = @transform_8, window_bounds = array<i64: 256, 384>}, {transform_indices = @transform_9, window_bounds = array<i64: 32, 128>}]} {
    %c0 = arith.constant 0 : index
    %c0_0 = arith.constant 0 : index
    %0 = vector.load %arg1[%c0, %c0_0] : memref<32x128xf32, #tpu.memory_space<vmem>>, vector<32x128xf32>
    %1 = tpu.iota {dimensions = array<i32: 0>} : vector<32x128xi32>
    %c16_i32 = arith.constant 16 : i32
    %c0_i32 = arith.constant 0 : i32
    %2 = arith.cmpi eq, %c16_i32, %c0_i32 : i32
    %c1_i32 = arith.constant 1 : i32
    %3 = arith.select %2, %c1_i32, %c16_i32 : i32
    %4 = vector.broadcast %3 : i32 to vector<32x128xi32>
    %5 = arith.remsi %1, %4 : vector<32x128xi32>
    %c0_i32_1 = arith.constant 0 : i32
    %6 = vector.broadcast %c0_i32_1 : i32 to vector<32x128xi32>
    %7 = arith.cmpi ne, %5, %6 : vector<32x128xi32>
    %c0_i32_2 = arith.constant 0 : i32
    %8 = vector.broadcast %c0_i32_2 : i32 to vector<32x128xi32>
    %9 = arith.cmpi slt, %5, %8 : vector<32x128xi32>
    %c0_i32_3 = arith.constant 0 : i32
    %10 = arith.cmpi slt, %3, %c0_i32_3 : i32
    %11 = vector.broadcast %10 : i1 to vector<32x128xi1>
    %12 = vector.broadcast %11 : vector<32x128xi1> to vector<32x128xi1>
    %13 = arith.xori %9, %12 : vector<32x128xi1>
    %14 = arith.andi %13, %7 : vector<32x128xi1>
    %15 = vector.broadcast %3 : i32 to vector<32x128xi32>
    %16 = arith.addi %5, %15 : vector<32x128xi32>
    %17 = arith.select %14, %16, %5 : vector<32x128xi1>, vector<32x128xi32>
    %c12_i32 = arith.constant 12 : i32
    %18 = vector.broadcast %c12_i32 : i32 to vector<32x128xi32>
    %19 = arith.cmpi sge, %17, %18 : vector<32x128xi32>
    %c6_i32 = arith.constant 6 : i32
    %20 = vector.broadcast %c6_i32 : i32 to vector<32x128xi32>
    %21 = arith.cmpi sge, %17, %20 : vector<32x128xi32>
    %c1_i32_4 = arith.constant 1 : i32
    %22 = vector.broadcast %c1_i32_4 : i32 to vector<32x128xi32>
    %23 = arith.cmpi sge, %17, %22 : vector<32x128xi32>
    %c15_i32 = arith.constant 15 : i32
    %24 = vector.broadcast %c15_i32 : i32 to vector<32x128xi32>
    %25 = arith.cmpi slt, %17, %24 : vector<32x128xi32>
    %c10_i32 = arith.constant 10 : i32
    %26 = vector.broadcast %c10_i32 : i32 to vector<32x128xi32>
    %27 = arith.cmpi slt, %17, %26 : vector<32x128xi32>
    %c4_i32 = arith.constant 4 : i32
    %28 = vector.broadcast %c4_i32 : i32 to vector<32x128xi32>
    %29 = arith.cmpi slt, %17, %28 : vector<32x128xi32>
    %c0_5 = arith.constant 0 : index
    %c0_6 = arith.constant 0 : index
    %30 = vector.load %arg2[%c0_5, %c0_6] : memref<128x384xf32, #tpu.memory_space<vmem>>, vector<128x384xf32>
    %cst = arith.constant dense<0.000000e+00> : vector<32x384xf32>
    %31 = tpu.matmul %0, %30, %cst {dimension_numbers = #tpu.dot_dimension_numbers<[1], [0], [0], [1], [0, 0, 1, 1], [], []>} : vector<32x128xf32>, vector<128x384xf32>, vector<32x384xf32> -> vector<32x384xf32>
    %32 = vector.extract_strided_slice %31 {offsets = [0, 0], sizes = [32, 128], strides = [1, 1]} : vector<32x384xf32> to vector<32x128xf32>
    %c1_i32_7 = arith.constant 1 : i32
    %33 = tpu.dynamic_rotate %32 by %c1_i32_7 dim 0 : vector<32x128xf32>, i32 -> vector<32x128xf32>
    %cst_8 = arith.constant 0.000000e+00 : f32
    %34 = vector.broadcast %cst_8 : f32 to vector<32x128xf32>
    %35 = arith.select %23, %33, %34 : vector<32x128xi1>, vector<32x128xf32>
    %36 = vector.extract_strided_slice %31 {offsets = [0, 128], sizes = [32, 128], strides = [1, 1]} : vector<32x384xf32> to vector<32x128xf32>
    %37 = arith.addf %35, %36 : vector<32x128xf32>
    %38 = vector.extract_strided_slice %31 {offsets = [0, 256], sizes = [32, 128], strides = [1, 1]} : vector<32x384xf32> to vector<32x128xf32>
    %c31_i32 = arith.constant 31 : i32
    %39 = tpu.dynamic_rotate %38 by %c31_i32 dim 0 : vector<32x128xf32>, i32 -> vector<32x128xf32>
    %cst_9 = arith.constant 0.000000e+00 : f32
    %40 = vector.broadcast %cst_9 : f32 to vector<32x128xf32>
    %41 = arith.select %25, %39, %40 : vector<32x128xi1>, vector<32x128xf32>
    %42 = arith.addf %37, %41 : vector<32x128xf32>
    %c0_10 = arith.constant 0 : index
    %c0_11 = arith.constant 0 : index
    %43 = vector.load %arg3[%c0_10, %c0_11] : memref<128x384xf32, #tpu.memory_space<vmem>>, vector<128x384xf32>
    %cst_12 = arith.constant dense<0.000000e+00> : vector<32x384xf32>
    %44 = tpu.matmul %42, %43, %cst_12 {dimension_numbers = #tpu.dot_dimension_numbers<[1], [0], [0], [1], [0, 0, 1, 1], [], []>} : vector<32x128xf32>, vector<128x384xf32>, vector<32x384xf32> -> vector<32x384xf32>
    %45 = vector.extract_strided_slice %44 {offsets = [0, 0], sizes = [32, 128], strides = [1, 1]} : vector<32x384xf32> to vector<32x128xf32>
    %c1_i32_13 = arith.constant 1 : i32
    %46 = tpu.dynamic_rotate %45 by %c1_i32_13 dim 0 : vector<32x128xf32>, i32 -> vector<32x128xf32>
    %cst_14 = arith.constant 0.000000e+00 : f32
    %47 = vector.broadcast %cst_14 : f32 to vector<32x128xf32>
    %48 = arith.select %23, %46, %47 : vector<32x128xi1>, vector<32x128xf32>
    %49 = vector.extract_strided_slice %44 {offsets = [0, 128], sizes = [32, 128], strides = [1, 1]} : vector<32x384xf32> to vector<32x128xf32>
    %50 = arith.addf %48, %49 : vector<32x128xf32>
    %51 = vector.extract_strided_slice %44 {offsets = [0, 256], sizes = [32, 128], strides = [1, 1]} : vector<32x384xf32> to vector<32x128xf32>
    %c31_i32_15 = arith.constant 31 : i32
    %52 = tpu.dynamic_rotate %51 by %c31_i32_15 dim 0 : vector<32x128xf32>, i32 -> vector<32x128xf32>
    %cst_16 = arith.constant 0.000000e+00 : f32
    %53 = vector.broadcast %cst_16 : f32 to vector<32x128xf32>
    %54 = arith.select %25, %52, %53 : vector<32x128xi1>, vector<32x128xf32>
    %55 = arith.addf %50, %54 : vector<32x128xf32>
    %c0_17 = arith.constant 0 : index
    %c0_18 = arith.constant 0 : index
    %56 = vector.load %arg4[%c0_17, %c0_18] : memref<1x128xf32, #tpu.memory_space<vmem>>, vector<1x128xf32>
    %57 = vector.broadcast %56 : vector<1x128xf32> to vector<32x128xf32>
    %58 = arith.addf %55, %57 : vector<32x128xf32>
    %cst_19 = arith.constant 0.000000e+00 : f32
    %59 = vector.broadcast %cst_19 : f32 to vector<32x128xf32>
    %60 = arith.maximumf %58, %59 : vector<32x128xf32>
    %c0_20 = arith.constant 0 : index
    %c0_21 = arith.constant 0 : index
    %61 = vector.load %arg5[%c0_20, %c0_21] : memref<128x384xf32, #tpu.memory_space<vmem>>, vector<128x384xf32>
    %cst_22 = arith.constant dense<0.000000e+00> : vector<32x384xf32>
    %62 = tpu.matmul %60, %61, %cst_22 {dimension_numbers = #tpu.dot_dimension_numbers<[1], [0], [0], [1], [0, 0, 1, 1], [], []>} : vector<32x128xf32>, vector<128x384xf32>, vector<32x384xf32> -> vector<32x384xf32>
    %63 = vector.extract_strided_slice %62 {offsets = [0, 0], sizes = [32, 128], strides = [1, 1]} : vector<32x384xf32> to vector<32x128xf32>
    %c1_i32_23 = arith.constant 1 : i32
    %64 = tpu.dynamic_rotate %63 by %c1_i32_23 dim 0 : vector<32x128xf32>, i32 -> vector<32x128xf32>
    %cst_24 = arith.constant 0.000000e+00 : f32
    %65 = vector.broadcast %cst_24 : f32 to vector<32x128xf32>
    %66 = arith.select %23, %64, %65 : vector<32x128xi1>, vector<32x128xf32>
    %67 = vector.extract_strided_slice %62 {offsets = [0, 128], sizes = [32, 128], strides = [1, 1]} : vector<32x384xf32> to vector<32x128xf32>
    %68 = arith.addf %66, %67 : vector<32x128xf32>
    %69 = vector.extract_strided_slice %62 {offsets = [0, 256], sizes = [32, 128], strides = [1, 1]} : vector<32x384xf32> to vector<32x128xf32>
    %c31_i32_25 = arith.constant 31 : i32
    %70 = tpu.dynamic_rotate %69 by %c31_i32_25 dim 0 : vector<32x128xf32>, i32 -> vector<32x128xf32>
    %cst_26 = arith.constant 0.000000e+00 : f32
    %71 = vector.broadcast %cst_26 : f32 to vector<32x128xf32>
    %72 = arith.select %25, %70, %71 : vector<32x128xi1>, vector<32x128xf32>
    %73 = arith.addf %68, %72 : vector<32x128xf32>
    %c0_27 = arith.constant 0 : index
    %c0_28 = arith.constant 0 : index
    %74 = vector.load %arg6[%c0_27, %c0_28] : memref<1x128xf32, #tpu.memory_space<vmem>>, vector<1x128xf32>
    %75 = vector.broadcast %74 : vector<1x128xf32> to vector<32x128xf32>
    %76 = arith.addf %73, %75 : vector<32x128xf32>
    %77 = arith.addf %76, %42 : vector<32x128xf32>
    %cst_29 = arith.constant 0.000000e+00 : f32
    %78 = vector.broadcast %cst_29 : f32 to vector<32x128xf32>
    %79 = arith.maximumf %77, %78 : vector<32x128xf32>
    %c0_30 = arith.constant 0 : index
    %c0_31 = arith.constant 0 : index
    %80 = vector.load %arg7[%c0_30, %c0_31] : memref<128x768xf32, #tpu.memory_space<vmem>>, vector<128x768xf32>
    %cst_32 = arith.constant dense<0.000000e+00> : vector<32x768xf32>
    %81 = tpu.matmul %79, %80, %cst_32 {dimension_numbers = #tpu.dot_dimension_numbers<[1], [0], [0], [1], [0, 0, 1, 1], [], []>} : vector<32x128xf32>, vector<128x768xf32>, vector<32x768xf32> -> vector<32x768xf32>
    %82 = vector.extract_strided_slice %81 {offsets = [0, 0], sizes = [32, 128], strides = [1, 1]} : vector<32x768xf32> to vector<32x128xf32>
    %c12_i32_33 = arith.constant 12 : i32
    %83 = tpu.dynamic_rotate %82 by %c12_i32_33 dim 0 : vector<32x128xf32>, i32 -> vector<32x128xf32>
    %cst_34 = arith.constant 0.000000e+00 : f32
    %84 = vector.broadcast %cst_34 : f32 to vector<32x128xf32>
    %85 = arith.select %19, %83, %84 : vector<32x128xi1>, vector<32x128xf32>
    %86 = vector.extract_strided_slice %81 {offsets = [0, 128], sizes = [32, 128], strides = [1, 1]} : vector<32x768xf32> to vector<32x128xf32>
    %c6_i32_35 = arith.constant 6 : i32
    %87 = tpu.dynamic_rotate %86 by %c6_i32_35 dim 0 : vector<32x128xf32>, i32 -> vector<32x128xf32>
    %cst_36 = arith.constant 0.000000e+00 : f32
    %88 = vector.broadcast %cst_36 : f32 to vector<32x128xf32>
    %89 = arith.select %21, %87, %88 : vector<32x128xi1>, vector<32x128xf32>
    %90 = arith.addf %85, %89 : vector<32x128xf32>
    %91 = vector.extract_strided_slice %81 {offsets = [0, 256], sizes = [32, 128], strides = [1, 1]} : vector<32x768xf32> to vector<32x128xf32>
    %92 = arith.addf %90, %91 : vector<32x128xf32>
    %93 = vector.extract_strided_slice %81 {offsets = [0, 384], sizes = [32, 128], strides = [1, 1]} : vector<32x768xf32> to vector<32x128xf32>
    %c26_i32 = arith.constant 26 : i32
    %94 = tpu.dynamic_rotate %93 by %c26_i32 dim 0 : vector<32x128xf32>, i32 -> vector<32x128xf32>
    %cst_37 = arith.constant 0.000000e+00 : f32
    %95 = vector.broadcast %cst_37 : f32 to vector<32x128xf32>
    %96 = arith.select %27, %94, %95 : vector<32x128xi1>, vector<32x128xf32>
    %97 = arith.addf %92, %96 : vector<32x128xf32>
    %98 = vector.extract_strided_slice %81 {offsets = [0, 512], sizes = [32, 128], strides = [1, 1]} : vector<32x768xf32> to vector<32x128xf32>
    %c20_i32 = arith.constant 20 : i32
    %99 = tpu.dynamic_rotate %98 by %c20_i32 dim 0 : vector<32x128xf32>, i32 -> vector<32x128xf32>
    %cst_38 = arith.constant 0.000000e+00 : f32
    %100 = vector.broadcast %cst_38 : f32 to vector<32x128xf32>
    %101 = arith.select %29, %99, %100 : vector<32x128xi1>, vector<32x128xf32>
    %102 = arith.addf %97, %101 : vector<32x128xf32>
    %103 = vector.extract_strided_slice %81 {offsets = [0, 640], sizes = [32, 128], strides = [1, 1]} : vector<32x768xf32> to vector<32x128xf32>
    %104 = vector.shape_cast %103 : vector<32x128xf32> to vector<2x16x128xf32>
    %cst_39 = arith.constant dense<0.000000e+00> : vector<2x128xf32>
    %105 = vector.multi_reduction <add>, %104, %cst_39 [1] : vector<2x16x128xf32> to vector<2x128xf32>
    %106 = vector.shape_cast %105 : vector<2x128xf32> to vector<2x1x128xf32>
    %cst_40 = arith.constant 1.600000e+01 : f32
    %107 = vector.broadcast %cst_40 : f32 to vector<2x1x128xf32>
    %108 = arith.divf %106, %107 : vector<2x1x128xf32>
    %109 = vector.shape_cast %108 : vector<2x1x128xf32> to vector<2x1x128xf32>
    %110 = vector.broadcast %109 : vector<2x1x128xf32> to vector<2x16x128xf32>
    %111 = vector.shape_cast %110 : vector<2x16x128xf32> to vector<32x128xf32>
    %112 = arith.addf %102, %111 : vector<32x128xf32>
    %c0_41 = arith.constant 0 : index
    %c0_42 = arith.constant 0 : index
    %113 = vector.load %arg8[%c0_41, %c0_42] : memref<1x128xf32, #tpu.memory_space<vmem>>, vector<1x128xf32>
    %114 = vector.broadcast %113 : vector<1x128xf32> to vector<32x128xf32>
    %115 = arith.addf %112, %114 : vector<32x128xf32>
    %116 = tpu.concatenate %115, %79 in 1 : vector<32x128xf32>, vector<32x128xf32> -> vector<32x256xf32>
    %c0_43 = arith.constant 0 : index
    %c0_44 = arith.constant 0 : index
    %117 = vector.load %arg9[%c0_43, %c0_44] : memref<256x384xf32, #tpu.memory_space<vmem>>, vector<256x384xf32>
    %cst_45 = arith.constant dense<0.000000e+00> : vector<32x384xf32>
    %118 = tpu.matmul %116, %117, %cst_45 {dimension_numbers = #tpu.dot_dimension_numbers<[1], [0], [0], [1], [0, 0, 1, 1], [], []>} : vector<32x256xf32>, vector<256x384xf32>, vector<32x384xf32> -> vector<32x384xf32>
    %119 = vector.extract_strided_slice %118 {offsets = [0, 0], sizes = [32, 128], strides = [1, 1]} : vector<32x384xf32> to vector<32x128xf32>
    %c1_i32_46 = arith.constant 1 : i32
    %120 = tpu.dynamic_rotate %119 by %c1_i32_46 dim 0 : vector<32x128xf32>, i32 -> vector<32x128xf32>
    %cst_47 = arith.constant 0.000000e+00 : f32
    %121 = vector.broadcast %cst_47 : f32 to vector<32x128xf32>
    %122 = arith.select %23, %120, %121 : vector<32x128xi1>, vector<32x128xf32>
    %123 = vector.extract_strided_slice %118 {offsets = [0, 128], sizes = [32, 128], strides = [1, 1]} : vector<32x384xf32> to vector<32x128xf32>
    %124 = arith.addf %122, %123 : vector<32x128xf32>
    %125 = vector.extract_strided_slice %118 {offsets = [0, 256], sizes = [32, 128], strides = [1, 1]} : vector<32x384xf32> to vector<32x128xf32>
    %c31_i32_48 = arith.constant 31 : i32
    %126 = tpu.dynamic_rotate %125 by %c31_i32_48 dim 0 : vector<32x128xf32>, i32 -> vector<32x128xf32>
    %cst_49 = arith.constant 0.000000e+00 : f32
    %127 = vector.broadcast %cst_49 : f32 to vector<32x128xf32>
    %128 = arith.select %25, %126, %127 : vector<32x128xi1>, vector<32x128xf32>
    %129 = arith.addf %124, %128 : vector<32x128xf32>
    %c0_50 = arith.constant 0 : index
    %c0_51 = arith.constant 0 : index
    %130 = vector.load %arg10[%c0_50, %c0_51] : memref<32x128xf32, #tpu.memory_space<vmem>>, vector<32x128xf32>
    tpu.vector_store %arg10[%c0_50, %c0_51], %129 {strides = array<i32>} : memref<32x128xf32, #tpu.memory_space<vmem>>, vector<32x128xf32>,
    return
  }
  func.func @transform_0(%arg0: i32) -> (i32, i32) {
    %c0_i32 = arith.constant 0 : i32
    %c0_i32_0 = arith.constant 0 : i32
    return %arg0, %c0_i32 : i32, i32
  }
  func.func @transform_1(%arg0: i32) -> (i32, i32) {
    %c0_i32 = arith.constant 0 : i32
    %c0_i32_0 = arith.constant 0 : i32
    %c0_i32_1 = arith.constant 0 : i32
    return %c0_i32, %c0_i32_0 : i32, i32
  }
  func.func @transform_2(%arg0: i32) -> (i32, i32) {
    %c0_i32 = arith.constant 0 : i32
    %c0_i32_0 = arith.constant 0 : i32
    %c0_i32_1 = arith.constant 0 : i32
    return %c0_i32, %c0_i32_0 : i32, i32
  }
  func.func @transform_3(%arg0: i32) -> (i32, i32) {
    %c0_i32 = arith.constant 0 : i32
    %c0_i32_0 = arith.constant 0 : i32
    %c0_i32_1 = arith.constant 0 : i32
    return %c0_i32, %c0_i32_0 : i32, i32
  }
  func.func @transform_4(%arg0: i32) -> (i32, i32) {
    %c0_i32 = arith.constant 0 : i32
    %c0_i32_0 = arith.constant 0 : i32
    %c0_i32_1 = arith.constant 0 : i32
    return %c0_i32, %c0_i32_0 : i32, i32
  }
  func.func @transform_5(%arg0: i32) -> (i32, i32) {
    %c0_i32 = arith.constant 0 : i32
    %c0_i32_0 = arith.constant 0 : i32
    %c0_i32_1 = arith.constant 0 : i32
    return %c0_i32, %c0_i32_0 : i32, i32
  }
  func.func @transform_6(%arg0: i32) -> (i32, i32) {
    %c0_i32 = arith.constant 0 : i32
    %c0_i32_0 = arith.constant 0 : i32
    %c0_i32_1 = arith.constant 0 : i32
    return %c0_i32, %c0_i32_0 : i32, i32
  }
  func.func @transform_7(%arg0: i32) -> (i32, i32) {
    %c0_i32 = arith.constant 0 : i32
    %c0_i32_0 = arith.constant 0 : i32
    %c0_i32_1 = arith.constant 0 : i32
    return %c0_i32, %c0_i32_0 : i32, i32
  }
  func.func @transform_8(%arg0: i32) -> (i32, i32) {
    %c0_i32 = arith.constant 0 : i32
    %c0_i32_0 = arith.constant 0 : i32
    %c0_i32_1 = arith.constant 0 : i32
    return %c0_i32, %c0_i32_0 : i32, i32
  }
  func.func @transform_9(%arg0: i32) -> (i32, i32) {
    %c0_i32 = arith.constant 0 : i32
    %c0_i32_0 = arith.constant 0 : i32
    return %arg0, %c0_i32 : i32, i32
  }
}

</mosaic_0001>

<bundles_post_ra>
// kernel: _lambda_.1
= control target key start
LH: loop header
LB: loop body
LE: loop exit
PB: predicated region body
PF: predicated region fallthrough
CT: control target
= control target key end

     0   :  { %14 = vsyncpa [#allocation3], 0  ;;  %s3119_s0 = inlined_call_operand.vmem [shape: f32[64,128], index: 0, kind: input, shape index: {}]   ;;  %s3120_s1 = inlined_call_operand.hbm [shape: f32[128,384], index: 1, kind: input, shape index: {}]   ;;  %s3121_s2 = inlined_call_operand.hbm [shape: f32[128,384], index: 2, kind: input, shape index: {}]   ;;  %s3122_s3 = inlined_call_operand.vmem [shape: f32[1,128], index: 3, kind: input, shape index: {}, may-alias: {3,5}]   ;;  %s3123_s4 = inlined_call_operand.hbm [shape: f32[128,384], index: 4, kind: input, shape index: {}]   ;;  %s3124_s5 = inlined_call_operand.vmem [shape: f32[1,128], index: 5, kind: input, shape index: {}, may-alias: {3,5}]   ;;  %s3125_s6 = inlined_call_operand.vmem [shape: f32[128,768], index: 6, kind: input, shape index: {}]   ;;  %s3126_s7 = inlined_call_operand.vmem [shape: f32[1,128], index: 7, kind: input, shape index: {}]   ;;  %s3127_s8 = inlined_call_operand.vmem [shape: f32[256,384], index: 8, kind: input, shape index: {}]   ;;  %s3128_s9 = inlined_call_operand.vmem [shape: f32[64,128], index: 9, kind: output, shape index: {}]  }
   0x1   :  { %15 = vsyncpa [#allocation5], 0  ;;  %s2037_s30 = smov 0  }
   0x2 LB: > { %s1763_s10 = sadd.s32 4294967295, %s1979_s30   ;;  %p1765_p0 = scmp.ge.s32.totalorder %s1979_s30, 1  ;;  %s1979_s30 = sphi %s2037_s30, %s21_s30  }
   0x3   : > { %p246_p1 = scmp.lt.s32.totalorder %s1979_s30, 3  ;;  %p2047_p2 = scmp.eq.s32.totalorder %s1763_s10, 0 }
   0x4   : > { %s271_s14 = sshll.u32 %s3121_s2, 4  ;;  %s257_s18 = sshll.u32 %s3120_s1, 4  ;;  %s272_s14 = int_to_ptr.hbm [resolvable:$true] %s271_s14  ;;  %s258_s18 = int_to_ptr.hbm [resolvable:$true] %s257_s18 }
   0x5   : > { %p2054_p3 = pnand %p1765_p0, %p246_p1  ;;  %s1981_s19 = smov [#allocation4]  }
   0x6   : > { %s273_s20 = sshll.u32 %s1981_s19, 4  ;;  %s1982_s21 = smov [#allocation2]   ;;  %s274_s20 = int_to_ptr.vmem [resolvable:$true] %s273_s20 }
   0x7   : > { %p1840_p4 = pneg %p2054_p3  ;;  %s259_s22 = sshll.u32 %s1982_s21, 4  ;;  %s260_s22 = int_to_ptr.vmem [resolvable:$true] %s259_s22 }
   0x8   : > { %s288_s25 = sshll.u32 %s3123_s4, 4  ;;  %s1983_s26 = smov 384   ;;  %s289_s25 = int_to_ptr.hbm [resolvable:$true] %s288_s25 }
   0x9   : > { %p1841_p5 = pnand %p2047_p2, %p1840_p4  ;;  %s1984_s27 = smov 24  }
   0xa   : > { %s1985_s28 = smov [#allocation6]   ;;  %327 = sbr.rel (%p2054_p3) target bundleno = 943 (0x3af), region = 56 }
   0xb   : > { %1846 = dma.hbm_to_vmem [thread:$0]  (!%p1841_p5), %s272_s14, 6144, %s274_s20, [#allocation5], %s1983_s26, %s1983_s26, %s1984_s27  }
   0xc   : > { %1843 = dma.hbm_to_vmem [thread:$0]  (!%p1841_p5), %s258_s18, 6144, %s260_s22, [#allocation3], %s1983_s26, %s1983_s26, %s1984_s27  }
   0xd   : > { %s290_s29 = sshll.u32 %s1985_s28, 4  ;;  %s291_s29 = int_to_ptr.vmem [resolvable:$true] %s290_s29 }
   0xe   : > { %1849 = dma.hbm_to_vmem [thread:$0]  (!%p1841_p5), %s289_s25, 6144, %s291_s29, [#allocation5], %s1983_s26, %s1983_s26, %s1984_s27  }
   0xf   : > { %1970 = dma.done.wait (%p2047_p2), [#allocation3], 6144  }
  0x10   : > { %1972 = vsyncadd (%p2047_p2), [#allocation3], 4294961152 }
  0x11   : > { %1974 = dma.done.wait (%p2047_p2), [#allocation5], 12288  }
  0x12   : > { %1976 = vsyncadd (%p2047_p2), [#allocation5], 4294955008  ;;  %v512_v0 = vld [vmem:[#allocation2 + $0x168] sm:$0xff]  ;;  %v514_v1 = vld [vmem:[#allocation2 + $0x178] sm:$0xff]  ;;  %s1774_s11 = sshll.u32 %s1763_s10, 2 }
  0x13   : > { %v509_v2 = vld [vmem:[#allocation2 + $0x150] sm:$0xff]  ;;  %515 = vmatpush.msra.mxu0 %v512_v0  ;;  %573 = vmatpush.msra.mxu2 %v514_v1  ;;  %v511_v3 = vld [vmem:[#allocation2 + $0x160] sm:$0xff]  ;;  %v506_v5 = vld [vmem:[#allocation2 + $0x138] sm:$0xff]  ;;  %p375_p6 = scmp.lt.s32.totalorder %s1774_s11, 7 }
  0x14   : > { %v513_v4 = vld [vmem:[#allocation2 + $0x170] sm:$0xff]  ;;  %v508_v6 = vld [vmem:[#allocation2 + $0x148] sm:$0xff]  ;;  %v510_v7 = vld [vmem:[#allocation2 + $0x158] sm:$0xff] }
  0x15   : > { %544 = vmatpush.msra.mxu1 %v513_v4  ;;  %516 = vmatpush.msra.mxu0 %v509_v2  ;;  %v507_v8 = vld [vmem:[#allocation2 + $0x140] sm:$0xff]  ;;  %v505_v10 = vld [vmem:[#allocation2 + $0x130] sm:$0xff]  ;;  %v504_v11 = vld [vmem:[#allocation2 + $0x128] sm:$0xff]  ;;  %s3132_s11 = smov (!%p375_p6, %s1774_s11), 7 }
  0x16   : > { %574 = vmatpush.msra.mxu2 %v511_v3  ;;  %v503_v9 = vld [vmem:[#allocation2 + $0x120] sm:$0xff]  ;;  %v500_v12 = vld [vmem:[#allocation2 + $0x108] sm:$0xff]  ;;  %v502_v13 = vld [vmem:[#allocation2 + $0x118] sm:$0xff]  ;;  %s1775_s10 = sshll.u32 %s3132_s11, 3 }
  0x17   : > { %545 = vmatpush.msra.mxu1 %v510_v7  ;;  %517 = vmatpush.msra.mxu0 %v506_v5  ;;  %v501_v14 = vld [vmem:[#allocation2 + $0x110] sm:$0xff]  ;;  %v499_v16 = vld [vmem:[#allocation2 + $0x100] sm:$0xff]  ;;  %v498_v17 = vld [vmem:[#allocation2 + $0xf8] sm:$0xff]  ;;  %s378_s14 = scalar_lea.vmem %s3119_s0, %s1775_s10  ;;  %s3090_s29 = scalar_lea.vmem %s3128_s9, %s1775_s10 }
  0x18   : > { %575 = vmatpush.msra.mxu2 %v508_v6  ;;  %v497_v15 = vld [vmem:[#allocation2 + $0xf0] sm:$0xff]  ;;  %v494_v18 = vld [vmem:[#allocation2 + $0xd8] sm:$0xff]  ;;  %v496_v19 = vld [vmem:[#allocation2 + $0xe8] sm:$0xff] }
  0x19   : > { %546 = vmatpush.msra.mxu1 %v507_v8  ;;  %518 = vmatpush.msra.mxu0 %v503_v9  ;;  %v495_v20 = vld [vmem:[#allocation2 + $0xe0] sm:$0xff]  ;;  %v493_v22 = vld [vmem:[#allocation2 + $0xd0] sm:$0xff]  ;;  %v492_v23 = vld [vmem:[#allocation2 + $0xc8] sm:$0xff] }
  0x1a   : > { %576 = vmatpush.msra.mxu2 %v505_v10  ;;  %v491_v21 = vld [vmem:[#allocation2 + $0xc0] sm:$0xff]  ;;  %v488_v24 = vld [vmem:[#allocation2 + $0xa8] sm:$0xff]  ;;  %v490_v25 = vld [vmem:[#allocation2 + $0xb8] sm:$0xff] }
  0x1b   : > { %547 = vmatpush.msra.mxu1 %v504_v11  ;;  %519 = vmatpush.msra.mxu0 %v500_v12  ;;  %v489_v26 = vld [vmem:[#allocation2 + $0xb0] sm:$0xff]  ;;  %v487_v28 = vld [vmem:[#allocation2 + $0xa0] sm:$0xff]  ;;  %v486_v29 = vld [vmem:[#allocation2 + $0x98] sm:$0xff] }
  0x1c   : > { %577 = vmatpush.msra.mxu2 %v502_v13  ;;  %v485_v27 = vld [vmem:[#allocation2 + $0x90] sm:$0xff]  ;;  %v482_v30 = vld [vmem:[#allocation2 + $0x78] sm:$0xff]  ;;  %v484_v31 = vld [vmem:[#allocation2 + $0x88] sm:$0xff] }
  0x1d   : > { %548 = vmatpush.msra.mxu1 %v501_v14  ;;  %520 = vmatpush.msra.mxu0 %v497_v15  ;;  %v483_v32 = vld [vmem:[#allocation2 + $0x80] sm:$0xff]  ;;  %v481_v34 = vld [vmem:[#allocation2 + $0x70] sm:$0xff]  ;;  %v480_v35 = vld [vmem:[#allocation2 + $0x68] sm:$0xff] }
  0x1e   : > { %578 = vmatpush.msra.mxu2 %v499_v16  ;;  %v479_v33 = vld [vmem:[#allocation2 + $0x60] sm:$0xff]  ;;  %v476_v36 = vld [vmem:[#allocation2 + $0x48] sm:$0xff]  ;;  %v478_v37 = vld [vmem:[#allocation2 + $0x58] sm:$0xff] }
  0x1f   : > { %549 = vmatpush.msra.mxu1 %v498_v17  ;;  %521 = vmatpush.msra.mxu0 %v494_v18  ;;  %v477_v38 = vld [vmem:[#allocation2 + $0x50] sm:$0xff]  ;;  %v475_v40 = vld [vmem:[#allocation2 + $0x40] sm:$0xff]  ;;  %v474_v41 = vld [vmem:[#allocation2 + $0x38] sm:$0xff] }
  0x20   : > { %579 = vmatpush.msra.mxu2 %v496_v19  ;;  %v473_v39 = vld [vmem:[#allocation2 + $0x30] sm:$0xff]  ;;  %v470_v42 = vld [vmem:[#allocation2 + $0x18] sm:$0xff]  ;;  %v472_v43 = vld [vmem:[#allocation2 + $0x28] sm:$0xff] }
  0x21   : > { %550 = vmatpush.msra.mxu1 %v495_v20  ;;  %522 = vmatpush.msra.mxu0 %v491_v21  ;;  %v471_v44 = vld [vmem:[#allocation2 + $0x20] sm:$0xff]  ;;  %v469_v46 = vld [vmem:[#allocation2 + $0x10] sm:$0xff]  ;;  %v468_v48 = vld [vmem:[#allocation2 + $0x8] sm:$0xff] }
  0x22   : > { %580 = vmatpush.msra.mxu2 %v493_v22  ;;  %v467_v45 = vld [vmem:[#allocation2] sm:$0xff]  ;;  %v387_v49 = vld [vmem:[%s378_s14 + $0x8] sm:$0xff]  ;;  %v388_v50 = vld [vmem:[%s378_s14 + $0x10] sm:$0xff] }
  0x23   : > { %551 = vmatpush.msra.mxu1 %v492_v23  ;;  %523 = vmatpush.msra.mxu0 %v488_v24  ;;  %v386_v47 = vld [vmem:[%s378_s14] sm:$0xff]  ;;  %v389_v51 = vld [vmem:[%s378_s14 + $0x18] sm:$0xff]  ;;  %v681_v52 = vld [vmem:[#allocation4 + $0x168] sm:$0xff] }
  0x24   : > { %581 = vmatpush.msra.mxu2 %v490_v25  ;;  %v682_v53 = vld [vmem:[#allocation4 + $0x170] sm:$0xff]  ;;  %v683_v54 = vld [vmem:[#allocation4 + $0x178] sm:$0xff]  ;;  %684 = vmatpush.msra.mxu3 %v681_v52  ;;  %v680_v57 = vld [vmem:[#allocation4 + $0x160] sm:$0xff] }
  0x25   : > { %552 = vmatpush.msra.mxu1 %v489_v26  ;;  %524 = vmatpush.msra.mxu0 %v485_v27  ;;  %v678_v55 = vld [vmem:[#allocation4 + $0x150] sm:$0xff]  ;;  %v679_v56 = vld [vmem:[#allocation4 + $0x158] sm:$0xff]  ;;  %v676_v59 = vld [vmem:[#allocation4 + $0x140] sm:$0xff] }
  0x26   : > { %582 = vmatpush.msra.mxu2 %v487_v28  ;;  %685 = vmatpush.msra.mxu3 %v678_v55  ;;  %v675_v58 = vld [vmem:[#allocation4 + $0x138] sm:$0xff]  ;;  %v677_v60 = vld [vmem:[#allocation4 + $0x148] sm:$0xff]  ;;  %v672_v61 = vld [vmem:[#allocation4 + $0x120] sm:$0xff] }
  0x27   : > { %553 = vmatpush.msra.mxu1 %v486_v29  ;;  %525 = vmatpush.msra.mxu0 %v482_v30  ;;  %v673_v62 = vld [vmem:[#allocation4 + $0x128] sm:$0xff]  ;;  %v674_v63 = vld [vmem:[#allocation4 + $0x130] sm:$0xff]  ;;  %v671_v2 = vld [vmem:[#allocation4 + $0x118] sm:$0xff] }
  0x28   : > { %583 = vmatpush.msra.mxu2 %v484_v31  ;;  %686 = vmatpush.msra.mxu3 %v675_v58  ;;  %v669_v0 = vld [vmem:[#allocation4 + $0x108] sm:$0xff]  ;;  %v670_v1 = vld [vmem:[#allocation4 + $0x110] sm:$0xff]  ;;  %v667_v4 = vld [vmem:[#allocation4 + $0xf8] sm:$0xff] }
  0x29   : > { %554 = vmatpush.msra.mxu1 %v483_v32  ;;  %526 = vmatpush.msra.mxu0 %v479_v33  ;;  %v666_v3 = vld [vmem:[#allocation4 + $0xf0] sm:$0xff]  ;;  %v668_v5 = vld [vmem:[#allocation4 + $0x100] sm:$0xff]  ;;  %v663_v6 = vld [vmem:[#allocation4 + $0xd8] sm:$0xff] }
  0x2a   : > { %584 = vmatpush.msra.mxu2 %v481_v34  ;;  %687 = vmatpush.msra.mxu3 %v672_v61  ;;  %v664_v7 = vld [vmem:[#allocation4 + $0xe0] sm:$0xff]  ;;  %v665_v8 = vld [vmem:[#allocation4 + $0xe8] sm:$0xff]  ;;  %v662_v11 = vld [vmem:[#allocation4 + $0xd0] sm:$0xff] }
  0x2b   : > { %555 = vmatpush.msra.mxu1 %v480_v35  ;;  %527 = vmatpush.msra.mxu0 %v476_v36  ;;  %v660_v9 = vld [vmem:[#allocation4 + $0xc0] sm:$0xff]  ;;  %v661_v10 = vld [vmem:[#allocation4 + $0xc8] sm:$0xff]  ;;  %v658_v13 = vld [vmem:[#allocation4 + $0xb0] sm:$0xff] }
  0x2c   : > { %585 = vmatpush.msra.mxu2 %v478_v37  ;;  %688 = vmatpush.msra.mxu3 %v669_v0  ;;  %v657_v12 = vld [vmem:[#allocation4 + $0xa8] sm:$0xff]  ;;  %v659_v14 = vld [vmem:[#allocation4 + $0xb8] sm:$0xff]  ;;  %v654_v15 = vld [vmem:[#allocation4 + $0x90] sm:$0xff] }
  0x2d   : > { %556 = vmatpush.msra.mxu1 %v477_v38  ;;  %528 = vmatpush.msra.mxu0 %v473_v39  ;;  %v655_v16 = vld [vmem:[#allocation4 + $0x98] sm:$0xff]  ;;  %v656_v17 = vld [vmem:[#allocation4 + $0xa0] sm:$0xff]  ;;  %v653_v20 = vld [vmem:[#allocation4 + $0x88] sm:$0xff]  ;;  %v390_v39 = vlaneseq }
  0x2e   : > { %586 = vmatpush.msra.mxu2 %v475_v40  ;;  %689 = vmatpush.msra.mxu3 %v666_v3  ;;  %v651_v18 = vld [vmem:[#allocation4 + $0x78] sm:$0xff]  ;;  %v652_v19 = vld [vmem:[#allocation4 + $0x80] sm:$0xff]  ;;  %v649_v22 = vld [vmem:[#allocation4 + $0x68] sm:$0xff] }
  0x2f   : > { %557 = vmatpush.msra.mxu1 %v474_v41  ;;  %529 = vmatpush.msra.mxu0 %v470_v42  ;;  %v648_v21 = vld [vmem:[#allocation4 + $0x60] sm:$0xff]  ;;  %v650_v23 = vld [vmem:[#allocation4 + $0x70] sm:$0xff]  ;;  %v645_v24 = vld [vmem:[#allocation4 + $0x48] sm:$0xff]  ;;  %v2088_v42 = vshrl.u32 %v390_v39, 7 }
  0x30   : > { %587 = vmatpush.msra.mxu2 %v472_v43  ;;  %690 = vmatpush.msra.mxu3 %v663_v6  ;;  %v646_v25 = vld [vmem:[#allocation4 + $0x50] sm:$0xff]  ;;  %v647_v26 = vld [vmem:[#allocation4 + $0x58] sm:$0xff]  ;;  %v644_v29 = vld [vmem:[#allocation4 + $0x40] sm:$0xff] }
  0x31   : > { %558 = vmatpush.msra.mxu1 %v471_v44  ;;  %530 = vmatpush.msra.mxu0 %v467_v45  ;;  %v642_v27 = vld [vmem:[#allocation4 + $0x30] sm:$0xff]  ;;  %v643_v28 = vld [vmem:[#allocation4 + $0x38] sm:$0xff]  ;;  %v640_v31 = vld [vmem:[#allocation4 + $0x20] sm:$0xff]  ;;  %v2091_v44 = vand.u32 15, %v2088_v42  ;;  %vm606_vm1 = vcmp.lt.s32.totalorder %v2088_v42, 1  ;;  %vm623_vm2 = vcmp.lt.s32.totalorder %v2088_v42, 7 }
  0x32   : > { %588 = vmatpush.msra.mxu2 %v469_v46  ;;  %531 = vmatmul.f32.vlgmr.msra.gmra.mxu0 %v386_v47  ;;  %v639_v30 = vld [vmem:[#allocation4 + $0x18] sm:$0xff]  ;;  %v641_v32 = vld [vmem:[#allocation4 + $0x28] sm:$0xff]  ;;  %v636_v33 = vld [vmem:[#allocation4] sm:$0xff]  ;;  %vm1285_vm6 = vcmp.lt.s32.totalorder %v2088_v42, 6  ;;  %vm1306_vm8 = vcmp.lt.s32.totalorder %v2088_v42, 2  ;;  %vm1272_vm9 = vcmp.lt.s32.totalorder %v2088_v42, 4 }
  0x33   : > { %589 = vmatmul.f32.vlgmr.msra.gmra.mxu2 %v386_v47  ;;  %559 = vmatpush.msra.mxu1 %v468_v48  ;;  %v637_v34 = vld [vmem:[#allocation4 + $0x8] sm:$0xff]  ;;  %v638_v35 = vld [vmem:[#allocation4 + $0x10] sm:$0xff]  ;;  %vm451_vm0 = vcmp.ge.s32.totalorder %v2091_v44, 1  ;;  %v842_v39 = vld [vmem:[#allocation6 + $0xd8] sm:$0xff]  ;;  %vm447_vm7 = vcmp.ge.s32.totalorder %v2091_v44, 6  ;;  %vm463_vm11 = vcmp.lt.s32.totalorder %v2091_v44, 4 }
  0x34   : > { %560 = vmatmul.f32.vlgmr.msra.gmra.mxu1 %v386_v47  ;;  %713 = vmatpush.msrb.mxu0 %v682_v53  ;;  %v392_v47 = vadd.s32 8, %v2088_v42 }
  0x35   : > { %742 = vmatpush.msrb.mxu1 %v683_v54  ;;  %691 = vmatpush.msra.mxu3 %v660_v9  ;;  %v394_v9 = vadd.s32 24, %v2088_v42 }
  0x36   : > { %714 = vmatpush.msrb.mxu0 %v679_v56  ;;  %v2101_v54 = vand.u32 15, %v392_v47  ;;  %v836_v47 = vld [vmem:[#allocation6 + $0xa8] sm:$0xff] }
  0x37   : > { %743 = vmatpush.msrb.mxu1 %v680_v57  ;;  %692 = vmatpush.msra.mxu3 %v657_v12 }
  0x38   : > { %715 = vmatpush.msrb.mxu0 %v676_v59  ;;  %vm456_vm3 = vcmp.lt.s32.totalorder %v2101_v54, 15  ;;  %vm444_vm10 = vcmp.ge.s32.totalorder %v2101_v54, 12  ;;  %vm460_vm13 = vcmp.lt.s32.totalorder %v2101_v54, 10 }
  0x39   : > { %744 = vmatpush.msrb.mxu1 %v677_v60  ;;  %693 = vmatpush.msra.mxu3 %v654_v15  ;;  %v393_v60 = vadd.s32 16, %v2088_v42 }
  0x3a   : > { %534 = vmatmul.f32.gmra.mxu0 %v387_v49 }
  0x3b   : > { %592 = vmatmul.f32.gmra.mxu2 %v387_v49  ;;  %716 = vmatpush.msrb.mxu0 %v673_v62 }
  0x3c   : > { %563 = vmatmul.f32.gmra.mxu1 %v387_v49  ;;  %694 = vmatpush.msra.mxu3 %v651_v18 }
  0x3d   : > { %745 = vmatpush.msrb.mxu1 %v674_v63  ;;  %717 = vmatpush.msrb.mxu0 %v670_v1  ;;  %v2116_v1 = vand.u32 15, %v393_v60  ;;  %v824_v60 = vld [vmem:[#allocation6 + $0x48] sm:$0xff] }
  0x3e   : > { %695 = vmatpush.msra.mxu3 %v648_v21  ;;  %v860_v21 = vld [vmem:[#allocation6 + $0x168] sm:$0xff] }
  0x3f   : > { %746 = vmatpush.msrb.mxu1 %v671_v2  ;;  %718 = vmatpush.msrb.mxu0 %v667_v4  ;;  %vm453_vm4 = vcmp.ge.s32.totalorder %v2116_v1, 1  ;;  %vm449_vm14 = vcmp.ge.s32.totalorder %v2116_v1, 6 }
  0x40   : > { %696 = vmatpush.msra.mxu3 %v645_v24  ;;  %863 = vmatpush.msrb.mxu2 %v860_v21  ;;  %v857_v24 = vld [vmem:[#allocation6 + $0x150] sm:$0xff] }
  0x41   : > { %747 = vmatpush.msrb.mxu1 %v668_v5  ;;  %719 = vmatpush.msrb.mxu0 %v664_v7 }
  0x42   : > { %537 = vmatmul.f32.gmra.mxu0 %v388_v50  ;;  %697 = vmatpush.msra.mxu3 %v642_v27  ;;  %v854_v27 = vld [vmem:[#allocation6 + $0x138] sm:$0xff] }
  0x43   : > { %595 = vmatmul.f32.gmra.mxu2 %v388_v50  ;;  %748 = vmatpush.msrb.mxu1 %v665_v8 }
  0x44   : > { %566 = vmatmul.f32.gmra.mxu1 %v388_v50  ;;  %720 = vmatpush.msrb.mxu0 %v661_v10 }
  0x45   : > { %749 = vmatpush.msrb.mxu1 %v662_v11  ;;  %698 = vmatpush.msra.mxu3 %v639_v30  ;;  %v851_v30 = vld [vmem:[#allocation6 + $0x120] sm:$0xff] }
  0x46   : > { %721 = vmatpush.msrb.mxu0 %v658_v13  ;;  %v2133_v13 = vand.u32 15, %v394_v9  ;;  %864 = vmatpush.msrb.mxu2 %v857_v24 }
  0x47   : > { %750 = vmatpush.msrb.mxu1 %v659_v14  ;;  %699 = vmatpush.msra.mxu3 %v636_v33  ;;  %v848_v33 = vld [vmem:[#allocation6 + $0x108] sm:$0xff] }
  0x48   : > { %722 = vmatpush.msrb.mxu0 %v655_v16  ;;  %vm458_vm5 = vcmp.lt.s32.totalorder %v2133_v13, 15  ;;  %865 = vmatpush.msrb.mxu2 %v854_v27  ;;  %vm446_vm15 = vcmp.ge.s32.totalorder %v2133_v13, 12 }
  0x49   : > { %751 = vmatpush.msrb.mxu1 %v656_v17 }
  0x4a   : > { %540 = vmatmul.f32.gmra.mxu0 %v389_v51  ;;  %866 = vmatpush.msrb.mxu2 %v851_v30 }
  0x4b   : > { %598 = vmatmul.f32.gmra.mxu2 %v389_v51  ;;  %723 = vmatpush.msrb.mxu0 %v652_v19 }
  0x4c   : > { %569 = vmatmul.f32.gmra.mxu1 %v389_v51  ;;  %867 = vmatpush.msrb.mxu2 %v848_v33 }
  0x4d   : > { %752 = vmatpush.msrb.mxu1 %v653_v20  ;;  %724 = vmatpush.msrb.mxu0 %v649_v22  ;;  %v861_v22 = vld [vmem:[#allocation6 + $0x170] sm:$0xff] }
  0x4e   : > { %892 = vmatpush.msrb.mxu3 %v861_v22 }
  0x4f   : > { %753 = vmatpush.msrb.mxu1 %v650_v23  ;;  %725 = vmatpush.msrb.mxu0 %v646_v25  ;;  %v862_v23 = vld [vmem:[#allocation6 + $0x178] sm:$0xff] }
  0x50   : > { %v858_v25 = vld [vmem:[#allocation6 + $0x158] sm:$0xff] }
  0x51   : > { %754 = vmatpush.msrb.mxu1 %v647_v26  ;;  %726 = vmatpush.msrb.mxu0 %v643_v28  ;;  %v859_v26 = vld [vmem:[#allocation6 + $0x160] sm:$0xff] }
  0x52   : > { %893 = vmatpush.msrb.mxu3 %v858_v25  ;;  %v855_v28 = vld [vmem:[#allocation6 + $0x140] sm:$0xff] }
  0x53   : > { %755 = vmatpush.msrb.mxu1 %v644_v29  ;;  %727 = vmatpush.msrb.mxu0 %v640_v31  ;;  %v856_v29 = vld [vmem:[#allocation6 + $0x148] sm:$0xff] }
  0x54   : > { %894 = vmatpush.msrb.mxu3 %v855_v28  ;;  %v852_v31 = vld [vmem:[#allocation6 + $0x128] sm:$0xff] }
  0x55   : > { %756 = vmatpush.msrb.mxu1 %v641_v32  ;;  %728 = vmatpush.msrb.mxu0 %v637_v34  ;;  %v853_v32 = vld [vmem:[#allocation6 + $0x130] sm:$0xff] }
  0x56   : > { %895 = vmatpush.msrb.mxu3 %v852_v31  ;;  %v849_v34 = vld [vmem:[#allocation6 + $0x110] sm:$0xff] }
  0x57   : > { %757 = vmatpush.msrb.mxu1 %v638_v35  ;;  %921 = vmatpush.msra.mxu0 %v862_v23  ;;  %v850_v35 = vld [vmem:[#allocation6 + $0x118] sm:$0xff] }
  0x58   : > { %896 = vmatpush.msrb.mxu3 %v849_v34 }
  0x59   : > { %922 = vmatpush.msra.mxu0 %v859_v26 }
  0x5b   : > { %923 = vmatpush.msra.mxu0 %v856_v29 }
  0x5d   : > { %924 = vmatpush.msra.mxu0 %v853_v32 }
  0x5f   : > { %925 = vmatpush.msra.mxu0 %v850_v35 }
  0xaf   : > { %v532_v36 = vpop.f32.mrf.mxu0 }
  0xb0   : > { %v602_v46 = vrot.slane %v532_v36, 7  ;;  %v845_v36 = vld [vmem:[#allocation6 + $0xf0] sm:$0xff] }
  0xb1   : > { %v561_v43 = vpop.f32.mrf.mxu1  ;;  %868 = vmatpush.msrb.mxu2 %v845_v36 }
  0xb3   : > { %869 = vmatpush.msrb.mxu2 %v842_v39 }
  0xb6   : > { %v590_v37 = vpop.f32.mrf.mxu2 }
  0xb7   : > { %v535_v38 = vpop.f32.mrf.mxu0  ;;  %v619_v49 = vrot.slane %v590_v37, 1  ;;  %v846_v37 = vld [vmem:[#allocation6 + $0xf8] sm:$0xff] }
  0xb8   : > { %v603_v57 = vrot.slane %v535_v38, 7  ;;  %v847_v38 = vld [vmem:[#allocation6 + $0x100] sm:$0xff]  ;;  %897 = vmatpush.msrb.mxu3 %v846_v37 }
  0xb9   : > { %v564_v58 = vpop.f32.mrf.mxu1  ;;  %926 = vmatpush.msra.mxu0 %v847_v38  ;;  %v1870_v38 = vld [vmem:[%s3122_s3] ss:$0 sm:$0xff] }
  0xba   : > { %v609_v63 = vsel %vm606_vm1, %v602_v46, %v603_v57 }
  0xbb   : > { %v616_v3 = vadd.f32 %v609_v63, %v564_v58  ;;  %v828_v58 = vld [vmem:[#allocation6 + $0x68] sm:$0xff]  ;;  %v826_v63 = vld [vmem:[#allocation6 + $0x58] sm:$0xff] }
  0xbe   : > { %v593_v40 = vpop.f32.mrf.mxu2 }
  0xbf   : > { %v538_v41 = vpop.f32.mrf.mxu0  ;;  %v620_v50 = vrot.slane %v593_v40, 1  ;;  %v843_v40 = vld [vmem:[#allocation6 + $0xe0] sm:$0xff] }
  0xc0   : > { %v604_v0 = vrot.slane %v538_v41, 7  ;;  %v844_v41 = vld [vmem:[#allocation6 + $0xe8] sm:$0xff]  ;;  %898 = vmatpush.msrb.mxu3 %v843_v40 }
  0xc1   : > { %v626_v59 = vsel %vm623_vm2, %v619_v49, %v620_v50  ;;  %v567_v7 = vpop.f32.mrf.mxu1  ;;  %927 = vmatpush.msra.mxu0 %v844_v41 }
  0xc2   : > { %v608_v5 = vsel %vm606_vm1, %v603_v57, %v604_v0  ;;  %v827_v57 = vld [vmem:[#allocation6 + $0x60] sm:$0xff] }
  0xc3   : > { %v613_v10 = vsel %vm453_vm4, %v608_v5, 0.0  ;;  %v818_v5 = vld [vmem:[#allocation6 + $0x18] sm:$0xff] }
  0xc4   : > { %v617_v12 = vadd.f32 %v613_v10, %v567_v7  ;;  %v819_v7 = vld [vmem:[#allocation6 + $0x20] sm:$0xff] }
  0xc5   : > { %v815_v10 = vld [vmem:[#allocation6] sm:$0xff] }
  0xc6   : > { %v596_v51 = vpop.f32.mrf.mxu2 }
  0xc7   : > { %v541_v45 = vpop.f32.mrf.mxu0  ;;  %v621_v55 = vrot.slane %v596_v51, 1  ;;  %v834_v51 = vld [vmem:[#allocation6 + $0x98] sm:$0xff] }
  0xc8   : > { %v605_v48 = vrot.slane %v541_v45, 7  ;;  %v840_v45 = vld [vmem:[#allocation6 + $0xc8] sm:$0xff] }
  0xc9   : > { %v625_v62 = vsel %vm623_vm2, %v620_v50, %v621_v55  ;;  %v570_v16 = vpop.f32.mrf.mxu1  ;;  %899 = vmatpush.msrb.mxu3 %v840_v45  ;;  %v833_v50 = vld [vmem:[#allocation6 + $0x90] sm:$0xff] }
  0xca   : > { %v610_v52 = vsel %vm606_vm1, %v605_v48, %v602_v46  ;;  %v629_v2 = vsel %vm456_vm3, %v625_v62, 0.0  ;;  %v607_v17 = vsel %vm606_vm1, %v604_v0, %v605_v48  ;;  %v841_v46 = vld [vmem:[#allocation6 + $0xd0] sm:$0xff] }
  0xcb   : > { %v611_v53 = vsel %vm451_vm0, %v610_v52, 0.0  ;;  %v2123_v6 = vadd.f32 %v629_v2, %v616_v3  ;;  %v618_v19 = vadd.f32 %v607_v17, %v570_v16  ;;  %928 = vmatpush.msra.mxu0 %v841_v46  ;;  %v837_v48 = vld [vmem:[#allocation6 + $0xb0] sm:$0xff]  ;;  %v835_v52 = vld [vmem:[#allocation6 + $0xa0] sm:$0xff]  ;;  %v822_v2 = vld [vmem:[#allocation6 + $0x38] sm:$0xff] }
  0xcc   : > { %v615_v56 = vadd.f32 %v611_v53, %v561_v43  ;;  %v839_v43 = vld [vmem:[#allocation6 + $0xc0] sm:$0xff]  ;;  %900 = vmatpush.msrb.mxu3 %v837_v48  ;;  %v830_v53 = vld [vmem:[#allocation6 + $0x78] sm:$0xff]  ;;  %v825_v62 = vld [vmem:[#allocation6 + $0x50] sm:$0xff] }
  0xcd   : > { %870 = vmatpush.msrb.mxu2 %v839_v43  ;;  %v821_v0 = vld [vmem:[#allocation6 + $0x30] sm:$0xff]  ;;  %v823_v3 = vld [vmem:[#allocation6 + $0x40] sm:$0xff] }
  0xce   : > { %v2106_v61 = vadd.f32 %v626_v59, %v615_v56  ;;  %v599_v4 = vpop.f32.mrf.mxu2  ;;  %901 = vmatpush.msrb.mxu3 %v834_v51  ;;  %v832_v56 = vld [vmem:[#allocation6 + $0x88] sm:$0xff]  ;;  %v829_v59 = vld [vmem:[#allocation6 + $0x70] sm:$0xff] }
  0xcf   : > { %v622_v8 = vrot.slane %v599_v4, 1  ;;  %871 = vmatpush.msrb.mxu2 %v836_v47 }
  0xd0   : > { %700 = vmatmul.f32.vlgmr.msra.gmra.mxu3 %v2106_v61  ;;  %729 = vmatmul.f32.vlgmr.msrb.gmra.mxu0 %v2106_v61 }
  0xd1   : > { %758 = vmatmul.f32.vlgmr.msrb.gmra.mxu1 %v2106_v61  ;;  %v624_v11 = vsel %vm623_vm2, %v621_v55, %v622_v8  ;;  %v627_v15 = vsel %vm623_vm2, %v622_v8, %v619_v49  ;;  %v838_v49 = vld [vmem:[#allocation6 + $0xb8] sm:$0xff]  ;;  %872 = vmatpush.msrb.mxu2 %v833_v50  ;;  %v831_v55 = vld [vmem:[#allocation6 + $0x80] sm:$0xff]  ;;  %v820_v8 = vld [vmem:[#allocation6 + $0x28] sm:$0xff] }
  0xd2   : > { %v2135_v14 = vadd.f32 %v624_v11, %v617_v12  ;;  %v631_v18 = vsel %vm458_vm5, %v627_v15, 0.0  ;;  %929 = vmatpush.msra.mxu0 %v838_v49  ;;  %902 = vmatpush.msrb.mxu3 %v831_v55  ;;  %v816_v11 = vld [vmem:[#allocation6 + $0x8] sm:$0xff]  ;;  %v817_v12 = vld [vmem:[#allocation6 + $0x10] sm:$0xff] }
  0xd3   : > { %v2147_v20 = vadd.f32 %v631_v18, %v618_v19  ;;  %873 = vmatpush.msrb.mxu2 %v830_v53 }
  0xd4   : > { %930 = vmatpush.msra.mxu0 %v835_v52  ;;  %903 = vmatpush.msrb.mxu3 %v828_v58 }
  0xd5   : > { %874 = vmatpush.msrb.mxu2 %v827_v57 }
  0xd6   : > { %931 = vmatpush.msra.mxu0 %v832_v56  ;;  %904 = vmatpush.msrb.mxu3 %v825_v62 }
  0xd7   : > { %875 = vmatpush.msrb.mxu2 %v824_v60 }
  0xd8   : > { %703 = vmatmul.f32.gmra.mxu3 %v2123_v6  ;;  %732 = vmatmul.f32.gmra.mxu0 %v2123_v6 }
  0xd9   : > { %761 = vmatmul.f32.gmra.mxu1 %v2123_v6  ;;  %932 = vmatpush.msra.mxu0 %v829_v59 }
  0xda   : > { %876 = vmatpush.msrb.mxu2 %v821_v0  ;;  %905 = vmatpush.msrb.mxu3 %v822_v2 }
  0xdb   : > { %933 = vmatpush.msra.mxu0 %v826_v63 }
  0xdc   : > { %877 = vmatpush.msrb.mxu2 %v818_v5  ;;  %906 = vmatpush.msrb.mxu3 %v819_v7  ;;  %v1088_v5 = vld [vmem:[%s3125_s6 + $0x2d0] sm:$0xff]  ;;  %v1090_v7 = vld [vmem:[%s3125_s6 + $0x2e0] sm:$0xff] }
  0xdd   : > { %934 = vmatpush.msra.mxu0 %v823_v3  ;;  %1094 = vmatpush.msra.mxu1 %v1088_v5  ;;  %v1012_v5 = vld [vmem:[%s3125_s6 + $0x70] sm:$0xff] }
  0xde   : > { %878 = vmatpush.msrb.mxu2 %v815_v10  ;;  %907 = vmatpush.msrb.mxu3 %v816_v11  ;;  %v1082_v10 = vld [vmem:[%s3125_s6 + $0x2a0] sm:$0xff]  ;;  %v1084_v11 = vld [vmem:[%s3125_s6 + $0x2b0] sm:$0xff] }
  0xdf   : > { %935 = vmatpush.msra.mxu0 %v820_v8  ;;  %v1091_v8 = vld [vmem:[%s3125_s6 + $0x2e8] sm:$0xff]  ;;  %1095 = vmatpush.msra.mxu1 %v1082_v10  ;;  %v1006_v10 = vld [vmem:[%s3125_s6 + $0x40] sm:$0xff] }
  0xe0   : > { %706 = vmatmul.f32.gmra.mxu3 %v2135_v14  ;;  %735 = vmatmul.f32.gmra.mxu0 %v2135_v14 }
  0xe1   : > { %764 = vmatmul.f32.gmra.mxu1 %v2135_v14  ;;  %936 = vmatpush.msra.mxu0 %v817_v12  ;;  %v1085_v12 = vld [vmem:[%s3125_s6 + $0x2b8] sm:$0xff] }
  0xe2   : > { %1152 = vmatpush.msra.mxu3 %v1090_v7  ;;  %v1013_v7 = vld [vmem:[%s3125_s6 + $0x78] sm:$0xff] }
  0xe3   : > { %1181 = vmatpush.msrb.mxu0 %v1091_v8  ;;  %v1005_v8 = vld [vmem:[%s3125_s6 + $0x38] sm:$0xff] }
  0xe4   : > { %1153 = vmatpush.msra.mxu3 %v1084_v11  ;;  %v1007_v11 = vld [vmem:[%s3125_s6 + $0x48] sm:$0xff] }
  0xe5   : > { %1182 = vmatpush.msrb.mxu0 %v1085_v12  ;;  %v999_v12 = vld [vmem:[%s3125_s6 + $0x8] sm:$0xff] }
  0xe8   : > { %709 = vmatmul.f32.gmra.mxu3 %v2147_v20  ;;  %738 = vmatmul.f32.gmra.mxu0 %v2147_v20 }
  0xe9   : > { %767 = vmatmul.f32.gmra.mxu1 %v2147_v20 }
 0x14d   : > { %v730_v17 = vpop.f32.mrf.mxu0 }
 0x14e   : > { %v759_v9 = vpop.f32.mrf.mxu1 }
 0x14f   : > { %v787_v29 = vrot.slane %v759_v9, 1  ;;  %v1083_v9 = vld [vmem:[%s3125_s6 + $0x2a8] sm:$0xff] }
 0x153   : > { %v701_v4 = vpop.f32.mrf.mxu3 }
 0x154   : > { %v771_v23 = vrot.slane %v701_v4, 7  ;;  %v1089_v4 = vld [vmem:[%s3125_s6 + $0x2d8] sm:$0xff] }
 0x155   : > { %v733_v26 = vpop.f32.mrf.mxu0  ;;  %1123 = vmatpush.msra.mxu2 %v1089_v4  ;;  %v1010_v4 = vld [vmem:[%s3125_s6 + $0x60] sm:$0xff] }
 0x156   : > { %v762_v16 = vpop.f32.mrf.mxu1 }
 0x157   : > { %v788_v27 = vrot.slane %v762_v16, 1  ;;  %1124 = vmatpush.msra.mxu2 %v1083_v9  ;;  %v1076_v16 = vld [vmem:[%s3125_s6 + $0x270] sm:$0xff] }
 0x158   : > { %1096 = vmatpush.msra.mxu1 %v1076_v16  ;;  %v1004_v9 = vld [vmem:[%s3125_s6 + $0x30] sm:$0xff] }
 0x159   : > { %v793_v35 = vsel %vm623_vm2, %v787_v29, %v788_v27  ;;  %v1000_v16 = vld [vmem:[%s3125_s6 + $0x10] sm:$0xff] }
 0x15b   : > { %v704_v15 = vpop.f32.mrf.mxu3 }
 0x15c   : > { %v772_v21 = vrot.slane %v704_v15, 7  ;;  %v1077_v15 = vld [vmem:[%s3125_s6 + $0x278] sm:$0xff] }
 0x15d   : > { %v736_v47 = vpop.f32.mrf.mxu0  ;;  %1125 = vmatpush.msra.mxu2 %v1077_v15  ;;  %v998_v15 = vld [vmem:[%s3125_s6] sm:$0xff] }
 0x15e   : > { %v765_v19 = vpop.f32.mrf.mxu1  ;;  %v777_v30 = vsel %vm606_vm1, %v771_v23, %v772_v21 }
 0x15f   : > { %v789_v24 = vrot.slane %v765_v19, 1  ;;  %v784_v36 = vadd.f32 %v777_v30, %v733_v26  ;;  %v1071_v19 = vld [vmem:[%s3125_s6 + $0x248] sm:$0xff]  ;;  %v1066_v26 = vld [vmem:[%s3125_s6 + $0x220] sm:$0xff]  ;;  %v1060_v30 = vld [vmem:[%s3125_s6 + $0x1f0] sm:$0xff] }
 0x160   : > { %1126 = vmatpush.msra.mxu2 %v1071_v19  ;;  %v1093_v19 = vld [vmem:[%s3125_s6 + $0x2f8] sm:$0xff] }
 0x161   : > { %v792_v32 = vsel %vm623_vm2, %v788_v27, %v789_v24  ;;  %v1067_v27 = vld [vmem:[%s3125_s6 + $0x228] sm:$0xff] }
 0x162   : > { %v796_v39 = vsel %vm456_vm3, %v792_v32, 0.0  ;;  %v1053_v32 = vld [vmem:[%s3125_s6 + $0x1b8] sm:$0xff] }
 0x163   : > { %v707_v18 = vpop.f32.mrf.mxu3  ;;  %v800_v46 = vadd.f32 %v796_v39, %v784_v36  ;;  %v1047_v36 = vld [vmem:[%s3125_s6 + $0x188] sm:$0xff]  ;;  %v1049_v39 = vld [vmem:[%s3125_s6 + $0x198] sm:$0xff] }
 0x164   : > { %v773_v33 = vrot.slane %v707_v18, 7  ;;  %v1079_v18 = vld [vmem:[%s3125_s6 + $0x288] sm:$0xff] }
 0x165   : > { %v808_v51 = vadd.f32 %v1870_v38, %v800_v46  ;;  %v739_v57 = vpop.f32.mrf.mxu0  ;;  %1183 = vmatpush.msrb.mxu0 %v1079_v18  ;;  %v1035_v46 = vld [vmem:[%s3125_s6 + $0x128] sm:$0xff] }
 0x166   : > { %v776_v40 = vsel %vm606_vm1, %v772_v21, %v773_v33  ;;  %v768_v41 = vpop.f32.mrf.mxu1  ;;  %v1070_v21 = vld [vmem:[%s3125_s6 + $0x240] sm:$0xff] }
 0x167   : > { %v781_v48 = vsel %vm453_vm4, %v776_v40, 0.0  ;;  %v790_v49 = vrot.slane %v768_v41, 1  ;;  %v812_v55 = vmax.f32 %v808_v51, 0.0  ;;  %1097 = vmatpush.msra.mxu1 %v1070_v21  ;;  %v1041_v40 = vld [vmem:[%s3125_s6 + $0x158] sm:$0xff]  ;;  %v1040_v41 = vld [vmem:[%s3125_s6 + $0x150] sm:$0xff] }
 0x168   : > { %v785_v50 = vadd.f32 %v781_v48, %v736_v47  ;;  %v1034_v47 = vld [vmem:[%s3125_s6 + $0x120] sm:$0xff]  ;;  %v1036_v48 = vld [vmem:[%s3125_s6 + $0x130] sm:$0xff] }
 0x169   : > { %v791_v52 = vsel %vm623_vm2, %v789_v24, %v790_v49  ;;  %v794_v58 = vsel %vm623_vm2, %v790_v49, %v787_v29  ;;  %v1065_v24 = vld [vmem:[%s3125_s6 + $0x218] sm:$0xff]  ;;  %v1058_v29 = vld [vmem:[%s3125_s6 + $0x1e0] sm:$0xff]  ;;  %v1028_v51 = vld [vmem:[%s3125_s6 + $0xf0] sm:$0xff] }
 0x16a   : > { %v801_v53 = vadd.f32 %v791_v52, %v785_v50  ;;  %v798_v62 = vsel %vm458_vm5, %v794_v58, 0.0  ;;  %1127 = vmatpush.msra.mxu2 %v1065_v24  ;;  %v1037_v49 = vld [vmem:[%s3125_s6 + $0x138] sm:$0xff]  ;;  %v1030_v52 = vld [vmem:[%s3125_s6 + $0x100] sm:$0xff]  ;;  %v1092_v21 = vld [vmem:[%s3125_s6 + $0x2f0] sm:$0xff] }
 0x16b   : > { %v710_v22 = vpop.f32.mrf.mxu3  ;;  %v1029_v50 = vld [vmem:[%s3125_s6 + $0xf8] sm:$0xff]  ;;  %v1086_v24 = vld [vmem:[%s3125_s6 + $0x2c0] sm:$0xff] }
 0x16c   : > { %v774_v25 = vrot.slane %v710_v22, 7  ;;  %v809_v60 = vadd.f32 %v1870_v38, %v801_v53  ;;  %v1072_v22 = vld [vmem:[%s3125_s6 + $0x250] sm:$0xff]  ;;  %v1031_v53 = vld [vmem:[%s3125_s6 + $0x108] sm:$0xff]  ;;  %v1025_v58 = vld [vmem:[%s3125_s6 + $0xd8] sm:$0xff] }
 0x16e   : > { %v778_v28 = vsel %vm606_vm1, %v774_v25, %v771_v23  ;;  %v775_v56 = vsel %vm606_vm1, %v773_v33, %v774_v25  ;;  %v813_v63 = vmax.f32 %v809_v60, 0.0  ;;  %v1073_v23 = vld [vmem:[%s3125_s6 + $0x258] sm:$0xff]  ;;  %v1064_v25 = vld [vmem:[%s3125_s6 + $0x210] sm:$0xff] }
 0x16f   : > { %v779_v31 = vsel %vm451_vm0, %v778_v28, 0.0  ;;  %v786_v59 = vadd.f32 %v775_v56, %v739_v57  ;;  %1184 = vmatpush.msrb.mxu0 %v1073_v23  ;;  %1098 = vmatpush.msra.mxu1 %v1064_v25  ;;  %v1059_v28 = vld [vmem:[%s3125_s6 + $0x1e8] sm:$0xff]  ;;  %v1052_v33 = vld [vmem:[%s3125_s6 + $0x1b0] sm:$0xff]  ;;  %v1022_v56 = vld [vmem:[%s3125_s6 + $0xc0] sm:$0xff] }
 0x170   : > { %v783_v34 = vadd.f32 %v779_v31, %v730_v17  ;;  %v1078_v17 = vld [vmem:[%s3125_s6 + $0x280] sm:$0xff]  ;;  %1128 = vmatpush.msra.mxu2 %v1059_v28  ;;  %v1061_v31 = vld [vmem:[%s3125_s6 + $0x1f8] sm:$0xff]  ;;  %v1024_v57 = vld [vmem:[%s3125_s6 + $0xd0] sm:$0xff] }
 0x171   : > { %v802_v0 = vadd.f32 %v798_v62, %v786_v59  ;;  %1154 = vmatpush.msra.mxu3 %v1078_v17  ;;  %1185 = vmatpush.msrb.mxu0 %v1067_v27  ;;  %v1017_v62 = vld [vmem:[%s3125_s6 + $0x98] sm:$0xff]  ;;  %v1087_v23 = vld [vmem:[%s3125_s6 + $0x2c8] sm:$0xff]  ;;  %v1460_v25 = vld [vmem:[%s3127_s8 + $0x2d0] sm:$0xff] }
 0x172   : > { %v799_v37 = vadd.f32 %v793_v35, %v783_v34  ;;  %1099 = vmatpush.msra.mxu1 %v1058_v29  ;;  %v1054_v34 = vld [vmem:[%s3125_s6 + $0x1c0] sm:$0xff]  ;;  %1129 = vmatpush.msra.mxu2 %v1053_v32  ;;  %v1055_v35 = vld [vmem:[%s3125_s6 + $0x1c8] sm:$0xff]  ;;  %v1001_v17 = vld [vmem:[%s3125_s6 + $0x18] sm:$0xff] }
 0x173   : > { %v810_v2 = vadd.f32 %v1870_v38, %v802_v0  ;;  %1155 = vmatpush.msra.mxu3 %v1072_v22  ;;  %1186 = vmatpush.msrb.mxu0 %v1061_v31  ;;  %v1018_v0 = vld [vmem:[%s3125_s6 + $0xa0] sm:$0xff]  ;;  %v1463_v22 = vld [vmem:[%s3127_s8 + $0x2e8] sm:$0xff]  ;;  %v1081_v27 = vld [vmem:[%s3125_s6 + $0x298] sm:$0xff] }
 0x174   : > { %v807_v43 = vadd.f32 %v1870_v38, %v799_v37  ;;  %1100 = vmatpush.msra.mxu1 %v1052_v33  ;;  %v1046_v37 = vld [vmem:[%s3125_s6 + $0x180] sm:$0xff]  ;;  %v1048_v38 = vld [vmem:[%s3125_s6 + $0x190] sm:$0xff]  ;;  %1130 = vmatpush.msra.mxu2 %v1047_v36  ;;  %v1457_v29 = vld [vmem:[%s3127_s8 + $0x2b8] sm:$0xff] }
 0x175   : > { %v814_v3 = vmax.f32 %v810_v2, 0.0  ;;  %1156 = vmatpush.msra.mxu3 %v1066_v26  ;;  %1187 = vmatpush.msrb.mxu0 %v1055_v35  ;;  %v1019_v2 = vld [vmem:[%s3125_s6 + $0xa8] sm:$0xff]  ;;  %v1080_v28 = vld [vmem:[%s3125_s6 + $0x290] sm:$0xff]  ;;  %v1074_v31 = vld [vmem:[%s3125_s6 + $0x260] sm:$0xff] }
 0x176   : > { %v811_v45 = vmax.f32 %v807_v43, 0.0  ;;  %1101 = vmatpush.msra.mxu1 %v1046_v37  ;;  %v1042_v43 = vld [vmem:[%s3125_s6 + $0x160] sm:$0xff]  ;;  %1131 = vmatpush.msra.mxu2 %v1041_v40  ;;  %v1069_v35 = vld [vmem:[%s3125_s6 + $0x238] sm:$0xff]  ;;  %v1068_v36 = vld [vmem:[%s3125_s6 + $0x230] sm:$0xff] }
 0x177   : > { %1157 = vmatpush.msra.mxu3 %v1060_v30  ;;  %1188 = vmatpush.msrb.mxu0 %v1049_v39  ;;  %v1075_v30 = vld [vmem:[%s3125_s6 + $0x268] sm:$0xff]  ;;  %v1454_v32 = vld [vmem:[%s3127_s8 + $0x2a0] sm:$0xff]  ;;  %v1448_v40 = vld [vmem:[%s3127_s8 + $0x270] sm:$0xff] }
 0x178   : > { %879 = vmatmul.f32.vlgmr.msrb.gmra.mxu2 %v811_v45  ;;  %908 = vmatmul.f32.vlgmr.msrb.gmra.mxu3 %v811_v45  ;;  %v1451_v37 = vld [vmem:[%s3127_s8 + $0x288] sm:$0xff]  ;;  %v1062_v39 = vld [vmem:[%s3125_s6 + $0x200] sm:$0xff] }
 0x179   : > { %937 = vmatmul.f32.vlgmr.msra.gmra.mxu0 %v811_v45  ;;  %1158 = vmatpush.msra.mxu3 %v1054_v34  ;;  %v1043_v45 = vld [vmem:[%s3125_s6 + $0x168] sm:$0xff] }
 0x17a   : > { %1102 = vmatpush.msra.mxu1 %v1040_v41  ;;  %1189 = vmatpush.msrb.mxu0 %v1043_v45  ;;  %v1057_v41 = vld [vmem:[%s3125_s6 + $0x1d8] sm:$0xff] }
 0x17b   : > { %1159 = vmatpush.msra.mxu3 %v1048_v38  ;;  %1132 = vmatpush.msra.mxu2 %v1035_v46  ;;  %v1063_v38 = vld [vmem:[%s3125_s6 + $0x208] sm:$0xff]  ;;  %v1445_v45 = vld [vmem:[%s3127_s8 + $0x258] sm:$0xff] }
 0x17c   : > { %1103 = vmatpush.msra.mxu1 %v1034_v47  ;;  %1190 = vmatpush.msrb.mxu0 %v1037_v49  ;;  %v1051_v47 = vld [vmem:[%s3125_s6 + $0x1a8] sm:$0xff]  ;;  %v1442_v49 = vld [vmem:[%s3127_s8 + $0x240] sm:$0xff] }
 0x17d   : > { %1160 = vmatpush.msra.mxu3 %v1042_v43  ;;  %1133 = vmatpush.msra.mxu2 %v1029_v50  ;;  %v1056_v43 = vld [vmem:[%s3125_s6 + $0x1d0] sm:$0xff] }
 0x17e   : > { %1104 = vmatpush.msra.mxu1 %v1028_v51  ;;  %1191 = vmatpush.msrb.mxu0 %v1031_v53 }
 0x17f   : > { %1161 = vmatpush.msra.mxu3 %v1036_v48  ;;  %v1050_v48 = vld [vmem:[%s3125_s6 + $0x1a0] sm:$0xff] }
 0x180   : > { %882 = vmatmul.f32.gmra.mxu2 %v812_v55  ;;  %911 = vmatmul.f32.gmra.mxu3 %v812_v55 }
 0x181   : > { %940 = vmatmul.f32.gmra.mxu0 %v812_v55  ;;  %1162 = vmatpush.msra.mxu3 %v1030_v52  ;;  %v1023_v55 = vld [vmem:[%s3125_s6 + $0xc8] sm:$0xff] }
 0x182   : > { %1134 = vmatpush.msra.mxu2 %v1023_v55  ;;  %1105 = vmatpush.msra.mxu1 %v1022_v56  ;;  %v1045_v56 = vld [vmem:[%s3125_s6 + $0x178] sm:$0xff] }
 0x183   : > { %1163 = vmatpush.msra.mxu3 %v1024_v57  ;;  %1192 = vmatpush.msrb.mxu0 %v1025_v58  ;;  %v1044_v57 = vld [vmem:[%s3125_s6 + $0x170] sm:$0xff]  ;;  %v1439_v58 = vld [vmem:[%s3127_s8 + $0x228] sm:$0xff] }
 0x184   : > { %1135 = vmatpush.msra.mxu2 %v1017_v62 }
 0x185   : > { %1164 = vmatpush.msra.mxu3 %v1018_v0  ;;  %1193 = vmatpush.msrb.mxu0 %v1019_v2  ;;  %v1038_v0 = vld [vmem:[%s3125_s6 + $0x140] sm:$0xff]  ;;  %v1436_v2 = vld [vmem:[%s3127_s8 + $0x210] sm:$0xff] }
 0x187   : > { %1165 = vmatpush.msra.mxu3 %v1012_v5  ;;  %1194 = vmatpush.msrb.mxu0 %v1013_v7  ;;  %v1032_v5 = vld [vmem:[%s3125_s6 + $0x110] sm:$0xff] }
 0x188   : > { %885 = vmatmul.f32.gmra.mxu2 %v813_v63  ;;  %914 = vmatmul.f32.gmra.mxu3 %v813_v63 }
 0x189   : > { %943 = vmatmul.f32.gmra.mxu0 %v813_v63  ;;  %v1016_v63 = vld [vmem:[%s3125_s6 + $0x90] sm:$0xff]  ;;  %1166 = vmatpush.msra.mxu3 %v1006_v10  ;;  %v1433_v10 = vld [vmem:[%s3127_s8 + $0x1f8] sm:$0xff] }
 0x18a   : > { %1106 = vmatpush.msra.mxu1 %v1016_v63  ;;  %1195 = vmatpush.msrb.mxu0 %v1007_v11  ;;  %v1039_v63 = vld [vmem:[%s3125_s6 + $0x148] sm:$0xff] }
 0x18b   : > { %1167 = vmatpush.msra.mxu3 %v1000_v16  ;;  %v1026_v16 = vld [vmem:[%s3125_s6 + $0xe0] sm:$0xff] }
 0x18c   : > { %1107 = vmatpush.msra.mxu1 %v1010_v4  ;;  %1196 = vmatpush.msrb.mxu0 %v1001_v17  ;;  %v1033_v4 = vld [vmem:[%s3125_s6 + $0x118] sm:$0xff] }
 0x18e   : > { %1108 = vmatpush.msra.mxu1 %v1004_v9  ;;  %1495 = vmatpush.msra.mxu0 %v1463_v22 }
 0x190   : > { %888 = vmatmul.f32.gmra.mxu2 %v814_v3  ;;  %917 = vmatmul.f32.gmra.mxu3 %v814_v3 }
 0x191   : > { %946 = vmatmul.f32.gmra.mxu0 %v814_v3  ;;  %v1011_v3 = vld [vmem:[%s3125_s6 + $0x68] sm:$0xff]  ;;  %1109 = vmatpush.msra.mxu1 %v998_v15 }
 0x192   : > { %1136 = vmatpush.msra.mxu2 %v1011_v3  ;;  %1496 = vmatpush.msra.mxu0 %v1460_v25  ;;  %v1027_v15 = vld [vmem:[%s3125_s6 + $0xe8] sm:$0xff] }
 0x193   : > { %1210 = vmatpush.msrb.mxu1 %v1092_v21 }
 0x194   : > { %1137 = vmatpush.msra.mxu2 %v1005_v8  ;;  %1497 = vmatpush.msra.mxu0 %v1457_v29  ;;  %v1427_v29 = vld [vmem:[%s3127_s8 + $0x1c8] sm:$0xff] }
 0x195   : > { %1211 = vmatpush.msrb.mxu1 %v1086_v24 }
 0x196   : > { %1138 = vmatpush.msra.mxu2 %v999_v12  ;;  %1498 = vmatpush.msra.mxu0 %v1454_v32  ;;  %v1015_v32 = vld [vmem:[%s3125_s6 + $0x88] sm:$0xff] }
 0x197   : > { %1212 = vmatpush.msrb.mxu1 %v1080_v28  ;;  %v1020_v28 = vld [vmem:[%s3125_s6 + $0xb0] sm:$0xff] }
 0x198   : > { %1239 = vmatpush.msrb.mxu2 %v1093_v19  ;;  %1499 = vmatpush.msra.mxu0 %v1451_v37  ;;  %v1430_v19 = vld [vmem:[%s3127_s8 + $0x1e0] sm:$0xff] }
 0x199   : > { %1213 = vmatpush.msrb.mxu1 %v1074_v31 }
 0x19a   : > { %1240 = vmatpush.msrb.mxu2 %v1087_v23  ;;  %1500 = vmatpush.msra.mxu0 %v1448_v40  ;;  %v2521_v23 = vld [vmem:[%s3124_s5] ss:$0 sm:$0xff]  ;;  %v1008_v40 = vld [vmem:[%s3125_s6 + $0x50] sm:$0xff] }
 0x19b   : > { %1214 = vmatpush.msrb.mxu1 %v1068_v36 }
 0x19c   : > { %1241 = vmatpush.msrb.mxu2 %v1081_v27  ;;  %1501 = vmatpush.msra.mxu0 %v1445_v45  ;;  %v1021_v27 = vld [vmem:[%s3125_s6 + $0xb8] sm:$0xff] }
 0x19d   : > { %1215 = vmatpush.msrb.mxu1 %v1062_v39  ;;  %v1009_v39 = vld [vmem:[%s3125_s6 + $0x58] sm:$0xff] }
 0x19e   : > { %1242 = vmatpush.msrb.mxu2 %v1075_v30  ;;  %1502 = vmatpush.msra.mxu0 %v1442_v49 }
 0x19f   : > { %1216 = vmatpush.msrb.mxu1 %v1056_v43  ;;  %v1421_v43 = vld [vmem:[%s3127_s8 + $0x198] sm:$0xff] }
 0x1a0   : > { %1243 = vmatpush.msrb.mxu2 %v1069_v35  ;;  %1503 = vmatpush.msra.mxu0 %v1439_v58  ;;  %v1424_v35 = vld [vmem:[%s3127_s8 + $0x1b0] sm:$0xff] }
 0x1a1   : > { %1217 = vmatpush.msrb.mxu1 %v1050_v48 }
 0x1a2   : > { %1244 = vmatpush.msrb.mxu2 %v1063_v38  ;;  %1504 = vmatpush.msra.mxu0 %v1436_v2  ;;  %v2616_v2 = vld [vmem:[%s3127_s8 + $0x2c8] sm:$0xff] }
 0x1a3   : > { %1218 = vmatpush.msrb.mxu1 %v1044_v57  ;;  %v1461_v57 = vld [vmem:[%s3127_s8 + $0x2d8] sm:$0xff] }
 0x1a4   : > { %1245 = vmatpush.msrb.mxu2 %v1057_v41  ;;  %1505 = vmatpush.msra.mxu0 %v1433_v10  ;;  %v1449_v10 = vld [vmem:[%s3127_s8 + $0x278] sm:$0xff] }
 0x1a5   : > { %1219 = vmatpush.msrb.mxu1 %v1038_v0 }
 0x1a6   : > { %1246 = vmatpush.msrb.mxu2 %v1051_v47  ;;  %1506 = vmatpush.msra.mxu0 %v1430_v19  ;;  %v2675_v19 = vld [vmem:[%s3127_s8 + $0x250] sm:$0xff] }
 0x1a7   : > { %1220 = vmatpush.msrb.mxu1 %v1032_v5  ;;  %v1452_v5 = vld [vmem:[%s3127_s8 + $0x290] sm:$0xff] }
 0x1a8   : > { %1247 = vmatpush.msrb.mxu2 %v1045_v56  ;;  %1507 = vmatpush.msra.mxu0 %v1427_v29  ;;  %v2721_v29 = vld [vmem:[%s3127_s8 + $0x1f0] sm:$0xff] }
 0x1a9   : > { %1221 = vmatpush.msrb.mxu1 %v1026_v16  ;;  %v2665_v16 = vld [vmem:[%s3127_s8 + $0x268] sm:$0xff] }
 0x1aa   : > { %1248 = vmatpush.msrb.mxu2 %v1039_v63  ;;  %1508 = vmatpush.msra.mxu0 %v1424_v35  ;;  %v1419_v35 = vld [vmem:[%s3127_s8 + $0x188] sm:$0xff] }
 0x1ab   : > { %1222 = vmatpush.msrb.mxu1 %v1020_v28  ;;  %v1428_v28 = vld [vmem:[%s3127_s8 + $0x1d0] sm:$0xff] }
 0x1ac   : > { %1249 = vmatpush.msrb.mxu2 %v1033_v4  ;;  %1509 = vmatpush.msra.mxu0 %v1421_v43  ;;  %v2630_v4 = vld [vmem:[%s3127_s8 + $0x2b0] sm:$0xff] }
 0x1ad   : > { %v1412_v43 = vld [vmem:[%s3127_s8 + $0x150] sm:$0xff] }
 0x1ae   : > { %1250 = vmatpush.msrb.mxu2 %v1027_v15  ;;  %v1446_v15 = vld [vmem:[%s3127_s8 + $0x260] sm:$0xff] }
 0x1b0   : > { %1251 = vmatpush.msrb.mxu2 %v1021_v27  ;;  %v1431_v27 = vld [vmem:[%s3127_s8 + $0x1e8] sm:$0xff] }
 0x1b2   : > { %1252 = vmatpush.msrb.mxu2 %v1015_v32  ;;  %v1422_v32 = vld [vmem:[%s3127_s8 + $0x1a0] sm:$0xff] }
 0x1b4   : > { %1253 = vmatpush.msrb.mxu2 %v1009_v39  ;;  %v1415_v39 = vld [vmem:[%s3127_s8 + $0x168] sm:$0xff] }
 0x1b5   : > { %1466 = vmatpush.msrb.mxu3 %v1415_v39  ;;  %v1371_v39 = vld [vmem:[%s3127_s8 + $0x8] sm:$0xff] }
 0x1b7   : > { %1467 = vmatpush.msrb.mxu3 %v1412_v43  ;;  %v1417_v43 = vld [vmem:[%s3127_s8 + $0x178] sm:$0xff] }
 0x1f6   : > { %v2323_v59 = vpop.f32.mrf.mxu0 }
 0x1f7   : > { %v966_v11 = vrot.slane %v2323_v59, 1 }
 0x1fb   : > { %v2325_v60 = vpop.f32.mrf.mxu2  ;;  %v909_v33 = vpop.f32.mrf.mxu3 }
 0x1fc   : > { %v950_v52 = vrot.slane %v2325_v60, 7 }
 0x1fe   : > { %v2395_v26 = vpop.f32.mrf.mxu0 }
 0x1ff   : > { %v967_v62 = vrot.slane %v2395_v26, 1 }
 0x201   : > { %v972_v21 = vsel %vm623_vm2, %v966_v11, %v967_v62 }
 0x203   : > { %v2375_v18 = vpop.f32.mrf.mxu2  ;;  %v912_v53 = vpop.f32.mrf.mxu3 }
 0x204   : > { %v951_v50 = vrot.slane %v2375_v18, 7 }
 0x206   : > { %v2444_v46 = vpop.f32.mrf.mxu0  ;;  %v956_v3 = vsel %vm606_vm1, %v950_v52, %v951_v50 }
 0x207   : > { %v968_v51 = vrot.slane %v2444_v46, 1  ;;  %v963_v17 = vadd.f32 %v956_v3, %v912_v53  ;;  %v1418_v46 = vld [vmem:[%s3127_s8 + $0x180] sm:$0xff]  ;;  %v1455_v3 = vld [vmem:[%s3127_s8 + $0x2a8] sm:$0xff] }
 0x208   : > { %1510 = vmatpush.msra.mxu0 %v1418_v46  ;;  %v1403_v46 = vld [vmem:[%s3127_s8 + $0x108] sm:$0xff] }
 0x209   : > { %v971_v7 = vsel %vm623_vm2, %v967_v62, %v968_v51  ;;  %v1458_v62 = vld [vmem:[%s3127_s8 + $0x2c0] sm:$0xff] }
 0x20a   : > { %v975_v22 = vsel %vm456_vm3, %v971_v7, 0.0 }
 0x20b   : > { %v2415_v34 = vpop.f32.mrf.mxu2  ;;  %v979_v30 = vadd.f32 %v975_v22, %v963_v17  ;;  %v915_v36 = vpop.f32.mrf.mxu3  ;;  %v1443_v17 = vld [vmem:[%s3127_s8 + $0x248] sm:$0xff] }
 0x20c   : > { %v952_v8 = vrot.slane %v2415_v34, 7 }
 0x20d   : > { %v987_v45 = vadd.f32 %v2521_v23, %v979_v30  ;;  %v1425_v30 = vld [vmem:[%s3127_s8 + $0x1b8] sm:$0xff] }
 0x20e   : > { %v955_v24 = vsel %vm606_vm1, %v951_v50, %v952_v8  ;;  %v947_v25 = vpop.f32.mrf.mxu0  ;;  %v1002_v50 = vld [vmem:[%s3125_s6 + $0x20] sm:$0xff] }
 0x20f   : > { %v960_v37 = vsel %vm453_vm4, %v955_v24, 0.0  ;;  %v969_v38 = vrot.slane %v947_v25, 1  ;;  %v991_v53 = vadd.f32 %v987_v45, %v2123_v6  ;;  %v2599_v6 = vld [vmem:[%s3127_s8 + $0x2e0] sm:$0xff]  ;;  %v1413_v45 = vld [vmem:[%s3127_s8 + $0x158] sm:$0xff] }
 0x210   : > { %v964_v47 = vadd.f32 %v960_v37, %v915_v36  ;;  %v2699_v24 = vld [vmem:[%s3127_s8 + $0x220] sm:$0xff]  ;;  %v2751_v36 = vld [vmem:[%s3127_s8 + $0x1a8] sm:$0xff]  ;;  %v2759_v37 = vld [vmem:[%s3127_s8 + $0x190] sm:$0xff] }
 0x211   : > { %v970_v49 = vsel %vm623_vm2, %v968_v51, %v969_v38  ;;  %v1464_v51 = vld [vmem:[%s3127_s8 + $0x2f0] sm:$0xff]  ;;  %v973_v0 = vsel %vm623_vm2, %v969_v38, %v966_v11  ;;  %v1434_v25 = vld [vmem:[%s3127_s8 + $0x200] sm:$0xff] }
 0x212   : > { %v980_v56 = vadd.f32 %v970_v49, %v964_v47  ;;  %v977_v59 = vsel %vm458_vm5, %v973_v0, 0.0  ;;  %v1409_v47 = vld [vmem:[%s3127_s8 + $0x138] sm:$0xff]  ;;  %v1410_v49 = vld [vmem:[%s3127_s8 + $0x140] sm:$0xff]  ;;  %v1391_v0 = vld [vmem:[%s3127_s8 + $0xa8] sm:$0xff] }
 0x213   : > { %v2458_v55 = vpop.f32.mrf.mxu2  ;;  %v918_v63 = vpop.f32.mrf.mxu3  ;;  %1468 = vmatpush.msrb.mxu3 %v1409_v47  ;;  %v1414_v47 = vld [vmem:[%s3127_s8 + $0x160] sm:$0xff] }
 0x214   : > { %v953_v60 = vrot.slane %v2458_v55, 7  ;;  %v2605_v55 = vmax.f32 %v991_v53, 0.0  ;;  %v988_v34 = vadd.f32 %v2521_v23, %v980_v56  ;;  %v1400_v53 = vld [vmem:[%s3127_s8 + $0xf0] sm:$0xff] }
 0x216   : > { %v957_v9 = vsel %vm606_vm1, %v953_v60, %v950_v52  ;;  %v2584_v52 = vld [vmem:[%s3127_s8 + $0x2f8] sm:$0xff]  ;;  %v954_v58 = vsel %vm606_vm1, %v952_v8, %v953_v60  ;;  %v992_v7 = vadd.f32 %v988_v34, %v2135_v14  ;;  %v1394_v34 = vld [vmem:[%s3127_s8 + $0xc0] sm:$0xff] }
 0x217   : > { %v958_v12 = vsel %vm451_vm0, %v957_v9, 0.0  ;;  %v965_v60 = vadd.f32 %v954_v58, %v918_v63  ;;  %v2640_v9 = vld [vmem:[%s3127_s8 + $0x298] sm:$0xff]  ;;  %v1398_v63 = vld [vmem:[%s3127_s8 + $0xe0] sm:$0xff] }
 0x218   : > { %v962_v18 = vadd.f32 %v958_v12, %v909_v33  ;;  %v1014_v33 = vld [vmem:[%s3125_s6 + $0x80] sm:$0xff]  ;;  %v2646_v11 = vmax.f32 %v992_v7, 0.0  ;;  %v1389_v7 = vld [vmem:[%s3127_s8 + $0x98] sm:$0xff] }
 0x219   : > { %1223 = vmatpush.msrb.mxu1 %v1014_v33  ;;  %v981_v8 = vadd.f32 %v977_v59, %v965_v60  ;;  %v2653_v12 = vld [vmem:[%s3127_s8 + $0x280] sm:$0xff]  ;;  %v1395_v60 = vld [vmem:[%s3127_s8 + $0xc8] sm:$0xff] }
 0x21a   : > { %v978_v26 = vadd.f32 %v972_v21, %v962_v18  ;;  %v1440_v21 = vld [vmem:[%s3127_s8 + $0x230] sm:$0xff]  ;;  %v2741_v33 = vld [vmem:[%s3127_s8 + $0x1c0] sm:$0xff] }
 0x21b   : > { %1224 = vmatpush.msrb.mxu1 %v1008_v40  ;;  %v989_v14 = vadd.f32 %v2521_v23, %v981_v8  ;;  %v1416_v40 = vld [vmem:[%s3127_s8 + $0x170] sm:$0xff] }
 0x21c   : > { %v986_v31 = vadd.f32 %v2521_v23, %v978_v26  ;;  %v1437_v23 = vld [vmem:[%s3127_s8 + $0x218] sm:$0xff]  ;;  %v2708_v26 = vld [vmem:[%s3127_s8 + $0x208] sm:$0xff] }
 0x21d   : > { %1225 = vmatpush.msrb.mxu1 %v1002_v50  ;;  %v993_v18 = vadd.f32 %v989_v14, %v2147_v20  ;;  %v2687_v20 = vld [vmem:[%s3127_s8 + $0x238] sm:$0xff]  ;;  %v1407_v50 = vld [vmem:[%s3127_s8 + $0x128] sm:$0xff]  ;;  %v1382_v14 = vld [vmem:[%s3127_s8 + $0x60] sm:$0xff] }
 0x21e   : > { %v990_v41 = vadd.f32 %v986_v31, %v2106_v61  ;;  %v1003_v61 = vld [vmem:[%s3125_s6 + $0x28] sm:$0xff]  ;;  %v2732_v31 = vld [vmem:[%s3127_s8 + $0x1d8] sm:$0xff] }
 0x21f   : > { %1254 = vmatpush.msrb.mxu2 %v1003_v61  ;;  %v2681_v22 = vmax.f32 %v993_v18, 0.0  ;;  %v1406_v61 = vld [vmem:[%s3127_s8 + $0x120] sm:$0xff]  ;;  %v1380_v18 = vld [vmem:[%s3127_s8 + $0x50] sm:$0xff] }
 0x220   : > { %v2559_v48 = vmax.f32 %v990_v41, 0.0  ;;  %1469 = vmatpush.msrb.mxu3 %v1406_v61 }
 0x222   : > { %1110 = vmatmul.f32.vlgmr.msra.gmra.mxu1 %v2559_v48  ;;  %1139 = vmatmul.f32.vlgmr.msra.gmra.mxu2 %v2559_v48 }
 0x223   : > { %1168 = vmatmul.f32.vlgmr.msra.gmra.mxu3 %v2559_v48  ;;  %1197 = vmatmul.f32.vlgmr.msrb.gmra.mxu0 %v2559_v48 }
 0x224   : > { %1553 = vmatpush.msra.mxu2 %v1464_v51  ;;  %1611 = vmatpush.msrb.mxu0 %v2584_v52  ;;  %v1404_v51 = vld [vmem:[%s3127_s8 + $0x110] sm:$0xff] }
 0x225   : > { %1524 = vmatpush.msra.mxu1 %v1416_v40  ;;  %1470 = vmatpush.msrb.mxu3 %v1403_v46 }
 0x226   : > { %1554 = vmatpush.msra.mxu2 %v1461_v57  ;;  %1612 = vmatpush.msrb.mxu0 %v2599_v6  ;;  %v1401_v57 = vld [vmem:[%s3127_s8 + $0xf8] sm:$0xff] }
 0x227   : > { %1525 = vmatpush.msra.mxu1 %v1413_v45  ;;  %1471 = vmatpush.msrb.mxu3 %v1400_v53  ;;  %v1405_v53 = vld [vmem:[%s3127_s8 + $0x118] sm:$0xff] }
 0x228   : > { %1555 = vmatpush.msra.mxu2 %v1458_v62  ;;  %1613 = vmatpush.msrb.mxu0 %v2616_v2  ;;  %v1397_v62 = vld [vmem:[%s3127_s8 + $0xd8] sm:$0xff] }
 0x229   : > { %1526 = vmatpush.msra.mxu1 %v1410_v49  ;;  %1472 = vmatpush.msrb.mxu3 %v1397_v62 }
 0x22a   : > { %1113 = vmatmul.f32.gmra.mxu1 %v2605_v55  ;;  %1142 = vmatmul.f32.gmra.mxu2 %v2605_v55 }
 0x22b   : > { %1171 = vmatmul.f32.gmra.mxu3 %v2605_v55  ;;  %1200 = vmatmul.f32.gmra.mxu0 %v2605_v55 }
 0x22c   : > { %1556 = vmatpush.msra.mxu2 %v1455_v3  ;;  %1614 = vmatpush.msrb.mxu0 %v2630_v4  ;;  %v1392_v3 = vld [vmem:[%s3127_s8 + $0xb0] sm:$0xff] }
 0x22d   : > { %1527 = vmatpush.msra.mxu1 %v1407_v50  ;;  %1473 = vmatpush.msrb.mxu3 %v1394_v34  ;;  %v1411_v50 = vld [vmem:[%s3127_s8 + $0x148] sm:$0xff] }
 0x22e   : > { %1557 = vmatpush.msra.mxu2 %v1452_v5  ;;  %1615 = vmatpush.msrb.mxu0 %v2640_v9  ;;  %v1388_v5 = vld [vmem:[%s3127_s8 + $0x90] sm:$0xff] }
 0x22f   : > { %1528 = vmatpush.msra.mxu1 %v1404_v51  ;;  %1474 = vmatpush.msrb.mxu3 %v1391_v0  ;;  %v1408_v51 = vld [vmem:[%s3127_s8 + $0x130] sm:$0xff]  ;;  %v1399_v0 = vld [vmem:[%s3127_s8 + $0xe8] sm:$0xff] }
 0x230   : > { %1558 = vmatpush.msra.mxu2 %v1449_v10  ;;  %1616 = vmatpush.msrb.mxu0 %v2653_v12  ;;  %v1385_v10 = vld [vmem:[%s3127_s8 + $0x78] sm:$0xff] }
 0x231   : > { %1529 = vmatpush.msra.mxu1 %v1401_v57  ;;  %1475 = vmatpush.msrb.mxu3 %v1388_v5  ;;  %v1402_v57 = vld [vmem:[%s3127_s8 + $0x100] sm:$0xff] }
 0x232   : > { %1116 = vmatmul.f32.gmra.mxu1 %v2646_v11  ;;  %1145 = vmatmul.f32.gmra.mxu2 %v2646_v11 }
 0x233   : > { %1174 = vmatmul.f32.gmra.mxu3 %v2646_v11  ;;  %1203 = vmatmul.f32.gmra.mxu0 %v2646_v11 }
 0x234   : > { %1559 = vmatpush.msra.mxu2 %v1446_v15  ;;  %1617 = vmatpush.msrb.mxu0 %v2665_v16  ;;  %v1383_v15 = vld [vmem:[%s3127_s8 + $0x68] sm:$0xff] }
 0x235   : > { %1530 = vmatpush.msra.mxu1 %v1398_v63  ;;  %1476 = vmatpush.msrb.mxu3 %v1385_v10 }
 0x236   : > { %1560 = vmatpush.msra.mxu2 %v1443_v17  ;;  %1618 = vmatpush.msrb.mxu0 %v2675_v19  ;;  %v1379_v17 = vld [vmem:[%s3127_s8 + $0x48] sm:$0xff] }
 0x237   : > { %1531 = vmatpush.msra.mxu1 %v1395_v60  ;;  %1477 = vmatpush.msrb.mxu3 %v1382_v14 }
 0x238   : > { %1561 = vmatpush.msra.mxu2 %v1440_v21  ;;  %1619 = vmatpush.msrb.mxu0 %v2687_v20 }
 0x239   : > { %1532 = vmatpush.msra.mxu1 %v1392_v3  ;;  %1478 = vmatpush.msrb.mxu3 %v1379_v17 }
 0x23a   : > { %1119 = vmatmul.f32.gmra.mxu1 %v2681_v22  ;;  %1148 = vmatmul.f32.gmra.mxu2 %v2681_v22 }
 0x23b   : > { %1177 = vmatmul.f32.gmra.mxu3 %v2681_v22  ;;  %1206 = vmatmul.f32.gmra.mxu0 %v2681_v22 }
 0x23c   : > { %1562 = vmatpush.msra.mxu2 %v1437_v23  ;;  %1620 = vmatpush.msrb.mxu0 %v2699_v24  ;;  %v1376_v23 = vld [vmem:[%s3127_s8 + $0x30] sm:$0xff] }
 0x23d   : > { %1533 = vmatpush.msra.mxu1 %v1389_v7  ;;  %1479 = vmatpush.msrb.mxu3 %v1376_v23 }
 0x23e   : > { %1563 = vmatpush.msra.mxu2 %v1434_v25  ;;  %1621 = vmatpush.msrb.mxu0 %v2708_v26  ;;  %v1377_v25 = vld [vmem:[%s3127_s8 + $0x38] sm:$0xff] }
 0x240   : > { %1564 = vmatpush.msra.mxu2 %v1431_v27  ;;  %1622 = vmatpush.msrb.mxu0 %v2721_v29 }
 0x242   : > { %1226 = vmatmul.f32.vlgmr.msrb.gmra.mxu1 %v2559_v48  ;;  %1255 = vmatmul.f32.vlgmr.msrb.gmra.mxu2 %v2559_v48 }
 0x243   : > { %1511 = vmatmul.f32.vlgmr.msra.gmra.mxu0 %v2559_v48  ;;  %1565 = vmatpush.msra.mxu2 %v1428_v28  ;;  %v1373_v28 = vld [vmem:[%s3127_s8 + $0x18] sm:$0xff] }
 0x244   : > { %1623 = vmatpush.msrb.mxu0 %v2732_v31  ;;  %1480 = vmatpush.msrb.mxu3 %v1373_v28 }
 0x245   : > { %1566 = vmatpush.msra.mxu2 %v1425_v30  ;;  %v1374_v30 = vld [vmem:[%s3127_s8 + $0x20] sm:$0xff] }
 0x246   : > { %1624 = vmatpush.msrb.mxu0 %v2741_v33 }
 0x247   : > { %1567 = vmatpush.msra.mxu2 %v1422_v32  ;;  %v1986_v32 = vmov 16.0  }
 0x248   : > { %1625 = vmatpush.msrb.mxu0 %v2751_v36  ;;  %1873 = vrcp.f32 %v1986_v32 }
 0x249   : > { %1568 = vmatpush.msra.mxu2 %v1419_v35  ;;  %v1370_v35 = vld [vmem:[%s3127_s8] sm:$0xff] }
 0x24a   : > { %1229 = vmatmul.f32.gmra.mxu1 %v2605_v55  ;;  %1258 = vmatmul.f32.gmra.mxu2 %v2605_v55 }
 0x24b   : > { %1514 = vmatmul.f32.gmra.mxu0 %v2605_v55  ;;  %1781 = vmatpush.msrb.mxu2 %v2584_v52 }
 0x24c   : > { %1626 = vmatpush.msrb.mxu0 %v2759_v37  ;;  %1481 = vmatpush.msrb.mxu3 %v1370_v35 }
 0x24d   : > { %1784 = vmatpush.msrb.mxu2 %v2599_v6 }
 0x24e   : > { %1582 = vmatpush.msra.mxu3 %v1417_v43  ;;  %v2915_v49 = vpop.eup %1873 }
 0x24f   : > { %1787 = vmatpush.msrb.mxu2 %v2616_v2  ;;  %v1350_v46 = vmul.f32 16.0, %v2915_v49  ;;  %vm1354_vm12 = vweird.f32 %v2915_v49 }
 0x250   : > { %1583 = vmatpush.msra.mxu3 %v1414_v47 }
 0x251   : > { %1790 = vmatpush.msrb.mxu2 %v2630_v4  ;;  %v1351_v60 = vsub.f32 1.0, %v1350_v46 }
 0x252   : > { %1232 = vmatmul.f32.gmra.mxu1 %v2646_v11  ;;  %1261 = vmatmul.f32.gmra.mxu2 %v2646_v11 }
 0x253   : > { %1517 = vmatmul.f32.gmra.mxu0 %v2646_v11  ;;  %1793 = vmatpush.msrb.mxu2 %v2640_v9  ;;  %v1352_v17 = vmul.f32 %v2915_v49, %v1351_v60 }
 0x254   : > { %1584 = vmatpush.msra.mxu3 %v1411_v50  ;;  %v1387_v50 = vld [vmem:[%s3127_s8 + $0x88] sm:$0xff] }
 0x255   : > { %1796 = vmatpush.msrb.mxu2 %v2653_v12 }
 0x256   : > { %1585 = vmatpush.msra.mxu3 %v1408_v51 }
 0x257   : > { %1799 = vmatpush.msrb.mxu2 %v2665_v16 }
 0x258   : > { %1586 = vmatpush.msra.mxu3 %v1405_v53 }
 0x259   : > { %1802 = vmatpush.msrb.mxu2 %v2675_v19 }
 0x25a   : > { %1235 = vmatmul.f32.gmra.mxu1 %v2681_v22  ;;  %1264 = vmatmul.f32.gmra.mxu2 %v2681_v22 }
 0x25b   : > { %1520 = vmatmul.f32.gmra.mxu0 %v2681_v22  ;;  %1805 = vmatpush.msrb.mxu2 %v2687_v20 }
 0x25c   : > { %1587 = vmatpush.msra.mxu3 %v1402_v57 }
 0x25d   : > { %1808 = vmatpush.msrb.mxu2 %v2699_v24 }
 0x25e   : > { %1588 = vmatpush.msra.mxu3 %v1399_v0 }
 0x25f   : > { %1811 = vmatpush.msrb.mxu2 %v2708_v26 }
 0x261   : > { %1814 = vmatpush.msrb.mxu2 %v2721_v29 }
 0x262   : > { %1569 = vmatmul.f32.vlgmr.msra.gmra.mxu2 %v2559_v48 }
 0x263   : > { %1627 = vmatmul.f32.vlgmr.msrb.gmra.mxu0 %v2559_v48  ;;  %1817 = vmatpush.msrb.mxu2 %v2732_v31 }
 0x265   : > { %1820 = vmatpush.msrb.mxu2 %v2741_v33 }
 0x267   : > { %1823 = vmatpush.msrb.mxu2 %v2751_v36 }
 0x269   : > { %1826 = vmatpush.msrb.mxu2 %v2759_v37 }
 0x26a   : > { %1572 = vmatmul.f32.gmra.mxu2 %v2605_v55 }
 0x272   : > { %1575 = vmatmul.f32.gmra.mxu2 %v2646_v11 }
 0x27a   : > { %1578 = vmatmul.f32.gmra.mxu2 %v2681_v22 }
 0x282   : > { %1633 = vmatmul.f32.vlgmr.msrb.gmra.mxu2 %v2646_v11  ;;  %v1386_v11 = vld [vmem:[%s3127_s8 + $0x80] sm:$0xff] }
 0x283   : > { %1534 = vmatpush.msra.mxu1 %v1386_v11  ;;  %v1396_v11 = vld [vmem:[%s3127_s8 + $0xd0] sm:$0xff] }
 0x284   : > { %1589 = vmatpush.msra.mxu3 %v1396_v11 }
 0x285   : > { %1535 = vmatpush.msra.mxu1 %v1383_v15 }
 0x287   : > { %1536 = vmatpush.msra.mxu1 %v1380_v18 }
 0x289   : > { %1537 = vmatpush.msra.mxu1 %v1377_v25 }
 0x28b   : > { %1538 = vmatpush.msra.mxu1 %v1374_v30  ;;  %v1390_v30 = vld [vmem:[%s3127_s8 + $0xa0] sm:$0xff] }
 0x28d   : > { %1539 = vmatpush.msra.mxu1 %v1371_v39 }
 0x28f   : > { %1780 = vmatpush.msrb.mxu1 %v2584_v52 }
 0x291   : > { %1783 = vmatpush.msrb.mxu1 %v2599_v6 }
 0x293   : > { %1786 = vmatpush.msrb.mxu1 %v2616_v2 }
 0x295   : > { %1789 = vmatpush.msrb.mxu1 %v2630_v4 }
 0x297   : > { %1792 = vmatpush.msrb.mxu1 %v2640_v9 }
 0x299   : > { %1795 = vmatpush.msrb.mxu1 %v2653_v12 }
 0x29b   : > { %1798 = vmatpush.msrb.mxu1 %v2665_v16 }
 0x29d   : > { %1801 = vmatpush.msrb.mxu1 %v2675_v19 }
 0x29f   : > { %v2791_v38 = vpop.f32.mrf.mxu1  ;;  %1804 = vmatpush.msrb.mxu1 %v2687_v20 }
 0x2a0   : > { %v2905_v40 = vpop.f32.mrf.mxu0  ;;  %v1268_v18 = vrot.slane %v2791_v38, 4 }
 0x2a1   : > { %1807 = vmatpush.msrb.mxu1 %v2699_v24  ;;  %v1302_v53 = vrot.slane %v2905_v40, 6 }
 0x2a3   : > { %1810 = vmatpush.msrb.mxu1 %v2708_v26 }
 0x2a5   : > { %v2799_v41 = vpop.f32.mrf.mxu2  ;;  %1813 = vmatpush.msrb.mxu1 %v2721_v29 }
 0x2a6   : > { %v1281_v3 = vrot.slane %v2799_v41, 2  ;;  %v1169_v7 = vpop.f32.mrf.mxu3 }
 0x2a7   : > { %v2810_v48 = vpop.f32.mrf.mxu1  ;;  %1816 = vmatpush.msrb.mxu1 %v2732_v31 }
 0x2a8   : > { %v2933_v62 = vpop.f32.mrf.mxu0 }
 0x2a9   : > { %v1303_v39 = vrot.slane %v2933_v62, 6  ;;  %v1384_v62 = vld [vmem:[%s3127_s8 + $0x70] sm:$0xff]  ;;  %1819 = vmatpush.msrb.mxu1 %v2741_v33 }
 0x2ab   : > { %v1309_v60 = vsel %vm1306_vm8, %v1302_v53, %v1303_v39  ;;  %1822 = vmatpush.msrb.mxu1 %v2751_v36 }
 0x2ad   : > { %v2830_v56 = vpop.f32.mrf.mxu2  ;;  %1825 = vmatpush.msrb.mxu1 %v2759_v37 }
 0x2ae   : > { %v1282_v43 = vrot.slane %v2830_v56, 2 }
 0x2af   : > { %v2835_v58 = vpop.f32.mrf.mxu1 }
 0x2b0   : > { %v2975_v46 = vpop.f32.mrf.mxu0  ;;  %v1288_v0 = vsel %vm1285_vm6, %v1281_v3, %v1282_v43 }
 0x2b1   : > { %v1304_v11 = vrot.slane %v2975_v46, 6 }
 0x2b5   : > { %v2855_v59 = vpop.f32.mrf.mxu2 }
 0x2b7   : > { %v2863_v8 = vpop.f32.mrf.mxu1 }
 0x2b8   : > { %v1271_v14 = vrot.slane %v2863_v8, 4  ;;  %v1393_v8 = vld [vmem:[%s3127_s8 + $0xb8] sm:$0xff] }
 0x2b9   : > { %1590 = vmatpush.msra.mxu3 %v1393_v8 }
 0x2ba   : > { %v1276_v38 = vsel %vm1272_vm9, %v1271_v14, %v1268_v18 }
 0x2bb   : > { %1591 = vmatpush.msra.mxu3 %v1390_v30  ;;  %v1278_v57 = vsel %vm444_vm10, %v1276_v38, 0.0 }
 0x2bc   : > { %v1295_v14 = vadd.f32 %v1288_v0, %v1278_v57 }
 0x2bd   : > { %v2883_v21 = vpop.f32.mrf.mxu2  ;;  %1592 = vmatpush.msra.mxu3 %v1387_v50  ;;  %v1207_v50 = vpop.f32.mrf.mxu0 }
 0x2be   : > { %v1284_v63 = vrot.slane %v2883_v21, 2  ;;  %v1305_v0 = vrot.slane %v1207_v50, 6 }
 0x2bf   : > { %v2891_v27 = vpop.f32.mrf.mxu1  ;;  %1593 = vmatpush.msra.mxu3 %v1384_v62  ;;  %v1269_v62 = vrot.slane %v2810_v48, 4 }
 0x2c0   : > { %v1289_v41 = vsel %vm1285_vm6, %v1284_v63, %v1281_v3  ;;  %v1283_v3 = vrot.slane %v2855_v59, 2  ;;  %v1308_v59 = vsel %vm1306_vm8, %v1303_v39, %v1304_v11  ;;  %v1372_v39 = vld [vmem:[%s3127_s8 + $0x10] sm:$0xff] }
 0x2c1   : > { %v1290_v28 = vsel %vm447_vm7, %v1289_v41, 0.0  ;;  %vm465_vm7 = vcmp.lt.s32.totalorder %v2116_v1, 4 }
 0x2c5   : > { %v1256_v45 = vpop.f32.mrf.mxu2 }
 0x2c7   : > { %v1230_v61 = vpop.f32.mrf.mxu1 }
 0x2c8   : > { %v1320_v32 = vrot.slane %v1230_v61, 4  ;;  %v1298_v61 = vadd.f32 %v1290_v28, %v1169_v7  ;;  %v1375_v28 = vld [vmem:[%s3127_s8 + $0x28] sm:$0xff] }
 0x2cd   : > { %v1259_v34 = vpop.f32.mrf.mxu2 }
 0x2ce   : > { %v1335_v5 = vadd.f32 %v1259_v34, %v1256_v45  ;;  %v1353_v45 = vadd.f32 %v2915_v49, %v1352_v17  ;;  %v1381_v17 = vld [vmem:[%s3127_s8 + $0x58] sm:$0xff] }
 0x2cf   : > { %v1233_v10 = vpop.f32.mrf.mxu1  ;;  %1594 = vmatpush.msra.mxu3 %v1381_v17 }
 0x2d0   : > { %v1336_v15 = vrot.slane %v1335_v5, 4  ;;  %v1321_v25 = vrot.slane %v1233_v10, 4  ;;  %v2994_v7 = vsel %vm1354_vm12, %v2915_v49, %v1353_v45  ;;  %v1378_v49 = vld [vmem:[%s3127_s8 + $0x40] sm:$0xff]  ;;  %v1287_v45 = vsel %vm1285_vm6, %v1282_v43, %v1283_v3 }
 0x2d1   : > { %1595 = vmatpush.msra.mxu3 %v1378_v49 }
 0x2d2   : > { %v1337_v23 = vadd.f32 %v1336_v15, %v1335_v5  ;;  %v1324_v56 = vsel %vm1272_vm9, %v1320_v32, %v1321_v25  ;;  %v1172_v5 = vpop.f32.mrf.mxu3  ;;  %v1315_v15 = vadd.f32 %v1309_v60, %v1298_v61  ;;  %v3012_v25 = vld [vmem:[%s3126_s7] ss:$0 sm:$0xff]  ;;  %v1292_v60 = vsel %vm449_vm14, %v1287_v45, 0.0 }
 0x2d3   : > { %v1327_v10 = vsel %vm463_vm11, %v1324_v56, 0.0  ;;  %v1299_v30 = vadd.f32 %v1295_v14, %v1172_v5  ;;  %1596 = vmatpush.msra.mxu3 %v1375_v28 }
 0x2d4   : > { %v1338_v35 = vrot.slane %v1337_v23, 2 }
 0x2d5   : > { %v1262_v47 = vpop.f32.mrf.mxu2  ;;  %1597 = vmatpush.msra.mxu3 %v1372_v39 }
 0x2d6   : > { %v1339_v51 = vadd.f32 %v1338_v35, %v1337_v23  ;;  %v1331_v23 = vadd.f32 %v1327_v10, %v1315_v15 }
 0x2d7   : > { %v1236_v35 = vpop.f32.mrf.mxu1 }
 0x2d8   : > { %v1340_v34 = vrot.slane %v1339_v51, 1  ;;  %v1322_v56 = vrot.slane %v1236_v35, 4 }
 0x2da   : > { %v1341_v41 = vadd.f32 %v1340_v34, %v1339_v51  ;;  %v1312_v51 = vsel %vm460_vm13, %v1308_v59, 0.0  ;;  %v1175_v34 = vpop.f32.mrf.mxu3 }
 0x2db   : > { %v1316_v43 = vadd.f32 %v1312_v51, %v1299_v30 }
 0x2dc   : > { %v1356_v18 = vmul.f32 %v2994_v7, %v1341_v41  ;;  %v1300_v41 = vadd.f32 %v1292_v60, %v1175_v34 }
 0x2dd   : > { %v1265_v8 = vpop.f32.mrf.mxu2 }
 0x2de   : > { %v1358_v38 = vadd.f32 %v1356_v18, %v1331_v23  ;;  %v1342_v32 = vadd.f32 %v1265_v8, %v1262_v47  ;;  %v1270_v47 = vrot.slane %v2835_v58, 4  ;;  %v1319_v58 = vrot.slane %v2891_v27, 4 }
 0x2df   : > { %v1359_v10 = vadd.f32 %v1356_v18, %v1316_v43  ;;  %v1307_v27 = vsel %vm1306_vm8, %v1304_v11, %v1305_v0 }
 0x2e0   : > { %v1343_v46 = vrot.slane %v1342_v32, 4  ;;  %v3026_v61 = vadd.f32 %v3012_v25, %v1358_v38  ;;  %v1274_v14 = vsel %vm1272_vm9, %v1269_v62, %v1270_v47  ;;  %v1326_v48 = vsel %vm1272_vm9, %v1322_v56, %v1319_v58 }
 0x2e1   : > { %v1367_v49 = vadd.f32 %v3012_v25, %v1359_v10  ;;  %v1280_v18 = vsel %vm446_vm15, %v1274_v14, 0.0  ;;  %v1329_v23 = vsel %vm465_vm7, %v1326_v48, 0.0  ;;  %v1317_v8 = vadd.f32 %v1307_v27, %v1300_v41 }
 0x2e2   : > { %v1344_v57 = vadd.f32 %v1343_v46, %v1342_v32  ;;  %1482 = vmatmul.f32.vlgmr.msrb.gmra.mxu3 %v3026_v61  ;;  %1540 = vmatmul.f32.vlgmr.msra.gmra.mxu1 %v3026_v61  ;;  %v1178_v11 = vpop.f32.mrf.mxu3 }
 0x2e3   : > { %1782 = vmatpush.msrb.mxu3 %v2584_v52  ;;  %v1286_v52 = vsel %vm1285_vm6, %v1283_v3, %v1284_v63  ;;  %vm462_vm6 = vcmp.lt.s32.totalorder %v2133_v13, 10 }
 0x2e4   : > { %v1345_v5 = vrot.slane %v1344_v57, 2  ;;  %v1297_v28 = vadd.f32 %v1286_v52, %v1280_v18 }
 0x2e5   : > { %1785 = vmatpush.msrb.mxu3 %v2599_v6  ;;  %v1333_v6 = vadd.f32 %v1329_v23, %v1317_v8 }
 0x2e6   : > { %v1346_v15 = vadd.f32 %v1345_v5, %v1344_v57  ;;  %v1301_v63 = vadd.f32 %v1297_v28, %v1178_v11 }
 0x2e7   : > { %1788 = vmatpush.msrb.mxu3 %v2616_v2  ;;  %v1310_v2 = vsel %vm1306_vm8, %v1305_v0, %v1302_v53 }
 0x2e8   : > { %v1347_v17 = vrot.slane %v1346_v15, 1 }
 0x2e9   : > { %1791 = vmatpush.msrb.mxu3 %v2630_v4  ;;  %v1314_v4 = vsel %vm462_vm6, %v1310_v2, 0.0 }
 0x2ea   : > { %v1348_v59 = vadd.f32 %v1347_v17, %v1346_v15  ;;  %1485 = vmatmul.f32.gmra.mxu3 %v1367_v49  ;;  %1543 = vmatmul.f32.gmra.mxu1 %v1367_v49 }
 0x2eb   : > { %1794 = vmatpush.msrb.mxu3 %v2640_v9 }
 0x2ec   : > { %v1357_v21 = vmul.f32 %v2994_v7, %v1348_v59  ;;  %v1318_v7 = vadd.f32 %v1314_v4, %v1301_v63 }
 0x2ed   : > { %1797 = vmatpush.msrb.mxu3 %v2653_v12  ;;  %v1512_v12 = vpop.f32.mrf.mxu0 }
 0x2ee   : > { %v1360_v3 = vadd.f32 %v1357_v21, %v1333_v6  ;;  %v1361_v9 = vadd.f32 %v1357_v21, %v1318_v7 }
 0x2ef   : > { %1800 = vmatpush.msrb.mxu3 %v2665_v16 }
 0x2f0   : > { %v1368_v30 = vadd.f32 %v3012_v25, %v1360_v3  ;;  %v1369_v40 = vadd.f32 %v3012_v25, %v1361_v9 }
 0x2f1   : > { %1803 = vmatpush.msrb.mxu3 %v2675_v19 }
 0x2f2   : > { %1488 = vmatmul.f32.gmra.mxu3 %v1368_v30  ;;  %1546 = vmatmul.f32.gmra.mxu1 %v1368_v30 }
 0x2f3   : > { %1806 = vmatpush.msrb.mxu3 %v2687_v20 }
 0x2f5   : > { %1809 = vmatpush.msrb.mxu3 %v2699_v24  ;;  %v1515_v20 = vpop.f32.mrf.mxu0  ;;  %v1570_v24 = vpop.f32.mrf.mxu2 }
 0x2f7   : > { %1812 = vmatpush.msrb.mxu3 %v2708_v26 }
 0x2f9   : > { %1815 = vmatpush.msrb.mxu3 %v2721_v29 }
 0x2fa   : > { %1491 = vmatmul.f32.gmra.mxu3 %v1369_v40  ;;  %1549 = vmatmul.f32.gmra.mxu1 %v1369_v40 }
 0x2fb   : > { %1818 = vmatpush.msrb.mxu3 %v2732_v31 }
 0x2fd   : > { %1821 = vmatpush.msrb.mxu3 %v2741_v33  ;;  %v1518_v33 = vpop.f32.mrf.mxu0 }
 0x2ff   : > { %1824 = vmatpush.msrb.mxu3 %v2751_v36  ;;  %v1573_v36 = vpop.f32.mrf.mxu2 }
 0x301   : > { %1827 = vmatpush.msrb.mxu3 %v2759_v37 }
 0x302   : > { %1598 = vmatmul.f32.vlgmr.msra.gmra.mxu3 %v3026_v61  ;;  %1630 = vmatmul.f32.vlgmr.msrb.gmra.mxu1 %v2605_v55 }
 0x305   : > { %v1521_v55 = vpop.f32.mrf.mxu0 }
 0x307   : > { %v1576_v38 = vpop.f32.mrf.mxu2 }
 0x30a   : > { %1601 = vmatmul.f32.gmra.mxu3 %v1367_v49 }
 0x30d   : > { %v1628_v46 = vpop.f32.mrf.mxu0 }
 0x30f   : > { %v1579_v61 = vpop.f32.mrf.mxu2 }
 0x312   : > { %1604 = vmatmul.f32.gmra.mxu3 %v1368_v30 }
 0x317   : > { %v1634_v14 = vpop.f32.mrf.mxu2 }
 0x31a   : > { %1607 = vmatmul.f32.gmra.mxu3 %v1369_v40 }
 0x322   : > { %1636 = vmatmul.f32.vlgmr.msrb.gmra.mxu3 %v2681_v22 }
 0x35f   : > { %v1541_v16 = vpop.f32.mrf.mxu1 }
 0x360   : > { %v1571_v62 = vadd.f32 %v1570_v24, %v1541_v16 }
 0x365   : > { %v1483_v19 = vpop.f32.mrf.mxu3 }
 0x366   : > { %v1513_v35 = vadd.f32 %v1512_v12, %v1483_v19 }
 0x367   : > { %v1544_v29 = vpop.f32.mrf.mxu1 }
 0x368   : > { %v1640_v50 = vrot.slane %v1513_v35, 7  ;;  %v1574_v27 = vadd.f32 %v1573_v36, %v1544_v29 }
 0x36d   : > { %v1486_v26 = vpop.f32.mrf.mxu3 }
 0x36e   : > { %v1516_v34 = vadd.f32 %v1515_v20, %v1486_v26 }
 0x36f   : > { %v1547_v53 = vpop.f32.mrf.mxu1 }
 0x370   : > { %v1641_v10 = vrot.slane %v1516_v34, 7  ;;  %v1577_v2 = vadd.f32 %v1576_v38, %v1547_v53 }
 0x372   : > { %v1646_v15 = vsel %vm606_vm1, %v1640_v50, %v1641_v10 }
 0x373   : > { %v1653_v17 = vadd.f32 %v1646_v15, %v1574_v27 }
 0x375   : > { %v1489_v31 = vpop.f32.mrf.mxu3 }
 0x376   : > { %v1519_v18 = vadd.f32 %v1518_v33, %v1489_v31 }
 0x377   : > { %v1550_v37 = vpop.f32.mrf.mxu1 }
 0x378   : > { %v1642_v59 = vrot.slane %v1519_v18, 7  ;;  %v1580_v54 = vadd.f32 %v1579_v61, %v1550_v37 }
 0x37a   : > { %v1645_v6 = vsel %vm606_vm1, %v1641_v10, %v1642_v59 }
 0x37b   : > { %v1650_v11 = vsel %vm453_vm4, %v1645_v6, 0.0 }
 0x37c   : > { %v1654_v4 = vadd.f32 %v1650_v11, %v1577_v2 }
 0x37d   : > { %v1492_v25 = vpop.f32.mrf.mxu3 }
 0x37e   : > { %v1522_v32 = vadd.f32 %v1521_v55, %v1492_v25 }
 0x37f   : > { %v1631_v51 = vpop.f32.mrf.mxu1 }
 0x380   : > { %v1643_v22 = vrot.slane %v1522_v32, 7 }
 0x382   : > { %v1647_v39 = vsel %vm606_vm1, %v1643_v22, %v1640_v50  ;;  %v1644_v3 = vsel %vm606_vm1, %v1642_v59, %v1643_v22 }
 0x383   : > { %v1648_v57 = vsel %vm451_vm0, %v1647_v39, 0.0  ;;  %v1655_v7 = vadd.f32 %v1644_v3, %v1580_v54 }
 0x384   : > { %v1652_v58 = vadd.f32 %v1648_v57, %v1571_v62 }
 0x385   : > { %v1599_v45 = vpop.f32.mrf.mxu3 }
 0x386   : > { %v1629_v47 = vadd.f32 %v1628_v46, %v1599_v45 }
 0x388   : > { %v1656_v60 = vrot.slane %v1629_v47, 1 }
 0x38d   : > { %v1602_v56 = vpop.f32.mrf.mxu3 }
 0x38e   : > { %v1632_v43 = vadd.f32 %v1631_v51, %v1602_v56 }
 0x390   : > { %v1657_v0 = vrot.slane %v1632_v43, 1 }
 0x392   : > { %v1662_v5 = vsel %vm623_vm2, %v1656_v60, %v1657_v0 }
 0x393   : > { %v1668_v44 = vadd.f32 %v1662_v5, %v1652_v58 }
 0x395   : > { %1672 = vst [vmem:[%s3090_s29] sm:$0xff] %v1668_v44  ;;  %v1605_v41 = vpop.f32.mrf.mxu3 }
 0x396   : > { %v1635_v48 = vadd.f32 %v1634_v14, %v1605_v41 }
 0x398   : > { %v1658_v52 = vrot.slane %v1635_v48, 1 }
 0x39a   : > { %v1661_v49 = vsel %vm623_vm2, %v1657_v0, %v1658_v52 }
 0x39b   : > { %v1665_v23 = vsel %vm456_vm3, %v1661_v49, 0.0 }
 0x39c   : > { %v1669_v8 = vadd.f32 %v1665_v23, %v1653_v17 }
 0x39d   : > { %v1608_v28 = vpop.f32.mrf.mxu3 }
 0x39e   : > { %1673 = vst [vmem:[%s3090_s29 + $0x8] sm:$0xff] %v1669_v8 }
 0x3a5   : > { %v1637_v21 = vpop.f32.mrf.mxu3 }
 0x3a6   : > { %v1638_v63 = vadd.f32 %v1637_v21, %v1608_v28 }
 0x3a8   : > { %v1659_v30 = vrot.slane %v1638_v63, 1 }
 0x3aa   : > { %v1660_v9 = vsel %vm623_vm2, %v1658_v52, %v1659_v30  ;;  %v1663_v40 = vsel %vm623_vm2, %v1659_v30, %v1656_v60 }
 0x3ab   : > { %v1667_v12 = vsel %vm458_vm5, %v1663_v40, 0.0  ;;  %v1670_v1 = vadd.f32 %v1660_v9, %v1654_v4 }
 0x3ac   : > { %v1671_v16 = vadd.f32 %v1667_v12, %v1655_v7 }
 0x3ad   : > { %1674 = vst [vmem:[%s3090_s29 + $0x10] sm:$0xff] %v1670_v1 }
 0x3ae   : > { %1675 = vst [vmem:[%s3090_s29 + $0x18] sm:$0xff] %v1671_v16 }
 0x3af PF: > { %s21_s30 = sadd.s32 1, %s1979_s30  }
 0x3b0   : > { %p18_p7 = scmp.ge.s32.totalorder %s21_s30, 4  }
 0x3b2   :  { %20 = sbr.rel (!%p18_p7) target bundleno = 2 (0x2), region = 99 }
 0x3b7   :  { %1698 = vsyncpa [#allocation3], 1 }
 0x3b8   :  { %1700 = vsyncpa [#allocation3 + $0x1], 1 }
 0x3b9   :  { %1701 = vsyncpa [#allocation5], 1 }

</bundles_post_ra>
